<compile_context>
chip_gen: v7x
topology: tpu7x:2x2x1
jax: 0.10.0
libtpu: 0.0.40
codegen_flags: <defaults>
</compile_context>

<pallas_src>
import functools

import jax
import jax.numpy as jnp
from jax.experimental import pallas as pl
from jax.experimental.pallas import tpu as pltpu


def _layer_norm(x, gamma, beta, eps=1e-6):
    # Matches torch.nn.LayerNorm(d_model, eps=1e-6): biased variance over the last dim.
    mean = jnp.mean(x, axis=-1, keepdims=True)
    var = jnp.mean(jnp.square(x - mean), axis=-1, keepdims=True)
    return (x - mean) * jax.lax.rsqrt(var + eps) * gamma + beta


def _split_heads(x_flat, n_head, d):
    """[L, n_head*d] -> [n_head, L, d] via static lane slices + leading-axis stack."""
    return jnp.stack([x_flat[:, h * d:(h + 1) * d] for h in range(n_head)], axis=0)


def _attention_core(q_all, kv_all, bias, wo, gamma, beta, residual,
                    *, n_head, d_k, d_v, mm_dtype):
    """Scaled dot-product attention for all heads + output proj + residual + LayerNorm.

    q_all:    [Lq, H*d_k]        f32 (already projected)
    kv_all:   [Lk, H*(d_k+d_v)]  f32 (already projected; K columns first, then V)
    bias:     [Lq, Lk]           additive mask bias (0 where visible, -1e9 where masked)
    wo:       [H*d_v, D]         mm_dtype
    residual: [Lq, D]            f32
    Returns (out [Lq, D] f32, attn [H, Lq, Lk] f32).
    """
    scale = 1.0 / (float(d_k) ** 0.5)
    q = _split_heads(q_all * scale, n_head, d_k).astype(mm_dtype)                # [H, Lq, d_k]
    k = _split_heads(kv_all[:, :n_head * d_k], n_head, d_k).astype(mm_dtype)     # [H, Lk, d_k]
    v = _split_heads(kv_all[:, n_head * d_k:], n_head, d_v).astype(mm_dtype)     # [H, Lk, d_v]

    # Scores for all heads: canonical batched matmul, contraction on the last dim of both
    # operands (no explicit K transpose).
    s = jnp.einsum('hqe,hke->hqk', q, k, preferred_element_type=jnp.float32)     # [H, Lq, Lk]
    s = s + bias.astype(jnp.float32)                                             # broadcast over H
    s = s - jnp.max(s, axis=-1, keepdims=True)
    e = jnp.exp(s)
    attn = e / jnp.sum(e, axis=-1, keepdims=True)                                # exact softmax

    # TODO(synk): for large Lq/Lk replace the materialized [H, Lq, Lk] scores with a
    # flash-style online-softmax loop over Lk blocks (and add an Lq grid axis).
    ctx = jnp.einsum('hqk,hke->hqe', attn.astype(mm_dtype), v,
                     preferred_element_type=jnp.float32)                         # [H, Lq, d_v]

    # Merge heads to [Lq, H*d_v] and project with ONE matmul (fused output projection).
    ctx_m = jnp.concatenate([ctx[h] for h in range(n_head)], axis=-1)
    out = jnp.dot(ctx_m.astype(mm_dtype), wo,
                  preferred_element_type=jnp.float32) + residual                 # dropout = identity
    return _layer_norm(out, gamma, beta), attn


# ---------------------------------------------------------------------------
# Fused DecoderLayer kernel: self-attn -> enc-dec attn -> FFN (one batch element / step)
# ---------------------------------------------------------------------------
def _decoder_layer_kernel(
        dec_ref, enc_ref, slf_bias_ref, enc_bias_ref,
        s_wqkv_ref, s_wo_ref,
        c_wq_ref, c_wkv_ref, c_wo_ref,
        f_w1_ref, f_b1_ref, f_w2_ref,
        pk_ref,
        out_ref, slf_attn_ref, enc_attn_ref,
        *, n_head, d_k, d_v, mm_dtype):
    dec_bf = dec_ref[0]                               # [Lq, D] bf16 (MXU-ready)
    enc_bf = enc_ref[0]                               # [Lk, D] bf16
    dec = dec_bf.astype(jnp.float32)                  # f32 copy for residual / LN
    h_dk = n_head * d_k

    pk = pk_ref[...]                                  # [7, D] f32 packed small params
    s_gamma, s_beta = pk[0:1, :], pk[1:2, :]
    c_gamma, c_beta = pk[2:3, :], pk[3:4, :]
    f_gamma, f_beta = pk[4:5, :], pk[5:6, :]
    f_b2 = pk[6:7, :]

    # ---- 1) masked self-attention: fused QKV projection (one lane-dense MXU pass) ----
    s_qkv = jnp.dot(dec_bf, s_wqkv_ref[...],
                    preferred_element_type=jnp.float32)        # [Lq, H*(2*d_k+d_v)]
    x1, slf_attn = _attention_core(
        s_qkv[:, :h_dk], s_qkv[:, h_dk:], slf_bias_ref[0], s_wo_ref[...],
        s_gamma, s_beta, dec,
        n_head=n_head, d_k=d_k, d_v=d_v, mm_dtype=mm_dtype)
    # TODO(synk): with realistic Lk (>=128) this store is lane-dense; at toy Lk it is a
    # masked partial store (flattening the map would need an in-kernel lane reshape).
    slf_attn_ref[0] = slf_attn

    # ---- 2) encoder-decoder attention: fused KV projection on the encoder states ----
    c_q = jnp.dot(x1.astype(mm_dtype), c_wq_ref[...],
                  preferred_element_type=jnp.float32)           # [Lq, H*d_k]
    c_kv = jnp.dot(enc_bf, c_wkv_ref[...],
                   preferred_element_type=jnp.float32)          # [Lk, H*(d_k+d_v)]
    x2, enc_attn = _attention_core(
        c_q, c_kv, enc_bias_ref[0], c_wo_ref[...],
        c_gamma, c_beta, x1,
        n_head=n_head, d_k=d_k, d_v=d_v, mm_dtype=mm_dtype)
    enc_attn_ref[0] = enc_attn

    # ---- 3) position-wise FFN + residual + LayerNorm ----
    h = jnp.dot(x2.astype(mm_dtype), f_w1_ref[...],
                preferred_element_type=jnp.float32) + f_b1_ref[...]
    h = jnp.maximum(h, 0.0)                                     # ReLU
    y = jnp.dot(h.astype(mm_dtype), f_w2_ref[...],
                preferred_element_type=jnp.float32) + f_b2
    y = y + x2                                                  # residual (dropout = identity)
    out_ref[0] = _layer_norm(y, f_gamma, f_beta)


def decoder_layer(dec_input, enc_output, slf_attn_mask, dec_enc_attn_mask,
                  params, *, n_head, d_k, d_v, matmul_dtype=jnp.bfloat16):
    B, Lq, D = dec_input.shape
    Lk = enc_output.shape[1]
    sa, ca, ff = params["slf_attn"], params["enc_attn"], params["pos_ffn"]
    d_inner = ff["w1"].shape[1]
    mm = matmul_dtype

    # One-time wrapper-side packing (XLA ops outside the kernel):
    #   * fused projection weights -> lane-dense in-kernel matmuls,
    #   * packed [7, D] block for LayerNorm gamma/beta + FFN b2 (one DMA stream),
    #   * additive mask bias (0 / -1e9) in bf16,
    #   * activations cast to bf16 for DMA / MXU feeding.
    s_wqkv = jnp.concatenate([sa["wq"], sa["wk"], sa["wv"]], axis=1).astype(mm)  # [D, H*(2dk+dv)]
    s_wo = sa["wo"].astype(mm)                                                   # [H*d_v, D]
    c_wq = ca["wq"].astype(mm)                                                   # [D, H*d_k]
    c_wkv = jnp.concatenate([ca["wk"], ca["wv"]], axis=1).astype(mm)             # [D, H*(dk+dv)]
    c_wo = ca["wo"].astype(mm)
    f_w1 = ff["w1"].astype(mm)
    f_w2 = ff["w2"].astype(mm)
    f_b1 = ff["b1"].astype(jnp.float32)

    pk = jnp.concatenate([sa["gamma"], sa["beta"], ca["gamma"], ca["beta"],
                          ff["gamma"], ff["beta"], ff["b2"]], axis=0).astype(jnp.float32)

    neg = jnp.float32(-1e9)
    slf_bias = jnp.where(slf_attn_mask != 0, jnp.float32(0.0), neg).astype(mm)   # [B, Lq, Lq]
    enc_bias = jnp.where(dec_enc_attn_mask != 0, jnp.float32(0.0), neg).astype(mm)

    dec_bf = dec_input.astype(mm)
    enc_bf = enc_output.astype(mm)

    kernel = functools.partial(_decoder_layer_kernel, n_head=n_head, d_k=d_k,
                               d_v=d_v, mm_dtype=mm)

    def rep(shape):  # parameters resident across all grid steps (constant index map)
        return pl.BlockSpec(shape, lambda b: (0,) * len(shape))

    out, slf_attn, enc_attn = pl.pallas_call(
        kernel,
        out_shape=(jax.ShapeDtypeStruct((B, Lq, D), jnp.float32),
                   jax.ShapeDtypeStruct((B, n_head, Lq, Lq), jnp.float32),
                   jax.ShapeDtypeStruct((B, n_head, Lq, Lk), jnp.float32)),
        grid=(B,),
        in_specs=[
            pl.BlockSpec((1, Lq, D), lambda b: (b, 0, 0)),     # dec_input (bf16)
            pl.BlockSpec((1, Lk, D), lambda b: (b, 0, 0)),     # enc_output (bf16)
            pl.BlockSpec((1, Lq, Lq), lambda b: (b, 0, 0)),    # self-attn additive bias
            pl.BlockSpec((1, Lq, Lk), lambda b: (b, 0, 0)),    # enc-dec attn additive bias
            rep((D, n_head * (2 * d_k + d_v))),                # fused self-attn QKV weight
            rep((n_head * d_v, D)),                            # self-attn Wo
            rep((D, n_head * d_k)),                            # cross-attn Wq
            rep((D, n_head * (d_k + d_v))),                    # fused cross-attn KV weight
            rep((n_head * d_v, D)),                            # cross-attn Wo
            rep((D, d_inner)),                                 # FFN W1
            rep((1, d_inner)),                                 # FFN b1
            rep((d_inner, D)),                                 # FFN W2
            rep((7, D)),                                       # packed LN params + FFN b2
        ],
        out_specs=(pl.BlockSpec((1, Lq, D), lambda b: (b, 0, 0)),
                   pl.BlockSpec((1, n_head, Lq, Lq), lambda b: (b, 0, 0, 0)),
                   pl.BlockSpec((1, n_head, Lq, Lk), lambda b: (b, 0, 0, 0))),
        compiler_params=pltpu.CompilerParams(
            dimension_semantics=("parallel",)),
    )(dec_bf, enc_bf, slf_bias, enc_bias,
      s_wqkv, s_wo, c_wq, c_wkv, c_wo, f_w1, f_b1, f_w2, pk)
    return out, slf_attn, enc_attn


# ---------------------------------------------------------------------------
# Deterministic parameter init (synthetic weights; no checkpoint loading)
# ---------------------------------------------------------------------------
def init_mha_params(key, d_model, n_head, d_k, d_v):
    k1, k2, k3, k4 = jax.random.split(key, 4)
    s = 1.0 / (d_model ** 0.5)
    return dict(
        wq=jax.random.normal(k1, (d_model, n_head * d_k), jnp.float32) * s,
        wk=jax.random.normal(k2, (d_model, n_head * d_k), jnp.float32) * s,
        wv=jax.random.normal(k3, (d_model, n_head * d_v), jnp.float32) * s,
        wo=jax.random.normal(k4, (n_head * d_v, d_model), jnp.float32) * s,
        gamma=jnp.ones((1, d_model), jnp.float32),
        beta=jnp.zeros((1, d_model), jnp.float32),
    )


def init_ffn_params(key, d_model, d_inner):
    k1, k2 = jax.random.split(key, 2)
    s1 = 1.0 / (d_model ** 0.5)
    s2 = 1.0 / (d_inner ** 0.5)
    return dict(
        w1=jax.random.normal(k1, (d_model, d_inner), jnp.float32) * s1,
        b1=jnp.zeros((1, d_inner), jnp.float32),
        w2=jax.random.normal(k2, (d_inner, d_model), jnp.float32) * s2,
        b2=jnp.zeros((1, d_model), jnp.float32),
        gamma=jnp.ones((1, d_model), jnp.float32),
        beta=jnp.zeros((1, d_model), jnp.float32),
    )


if __name__ == "__main__":
    # TODO(synk): dropout (p=0.1) is treated as identity (eval mode); training-time
    # stochastic dropout is not implemented in the kernel.
    d_model, d_inner, n_head, d_k, d_v = 32, 64, 4, 8, 8
    B, L_dec, L_enc = 2, 8, 8

    key = jax.random.PRNGKey(0)
    k_slf, k_enc, k_ffn, k_x = jax.random.split(key, 4)

    params = dict(
        slf_attn=init_mha_params(k_slf, d_model, n_head, d_k, d_v),
        enc_attn=init_mha_params(k_enc, d_model, n_head, d_k, d_v),
        pos_ffn=init_ffn_params(k_ffn, d_model, d_inner),
    )

    kx1, kx2 = jax.random.split(k_x)
    dec_input = jax.random.normal(kx1, (B, L_dec, d_model), jnp.float32)
    enc_output = jax.random.normal(kx2, (B, L_enc, d_model), jnp.float32)

    # Causal self-attention mask; full visibility for encoder-decoder attention.
    slf_attn_mask = jnp.broadcast_to(
        jnp.tril(jnp.ones((L_dec, L_dec), jnp.int32))[None], (B, L_dec, L_dec))
    dec_enc_attn_mask = jnp.ones((B, L_dec, L_enc), jnp.int32)

    fwd = jax.jit(functools.partial(decoder_layer, n_head=n_head, d_k=d_k, d_v=d_v))
    dec_output, dec_slf_attn, dec_enc_attn = fwd(
        dec_input, enc_output, slf_attn_mask, dec_enc_attn_mask, params)

    jax.block_until_ready((dec_output, dec_slf_attn, dec_enc_attn))
    assert dec_output.shape == (B, L_dec, d_model)
    assert dec_slf_attn.shape == (B, n_head, L_dec, L_dec)
    assert dec_enc_attn.shape == (B, n_head, L_dec, L_enc)
    assert bool(jnp.all(jnp.isfinite(dec_output)))
    assert bool(jnp.all(jnp.isfinite(dec_slf_attn)))
    assert bool(jnp.all(jnp.isfinite(dec_enc_attn)))
    print("KERNEL_OK")
</pallas_src>

<mosaic_0001>
module attributes {stable_mosaic.version = 11 : i64} {
  func.func @_decoder_layer_kernel(%arg0: i32, %arg1: memref<1x8x32xbf16, #tpu.memory_space<vmem>>, %arg2: memref<1x8x32xbf16, #tpu.memory_space<vmem>>, %arg3: memref<1x8x8xbf16, #tpu.memory_space<vmem>>, %arg4: memref<1x8x8xbf16, #tpu.memory_space<vmem>>, %arg5: memref<32x96xbf16, #tpu.memory_space<vmem>>, %arg6: memref<32x32xbf16, #tpu.memory_space<vmem>>, %arg7: memref<32x32xbf16, #tpu.memory_space<vmem>>, %arg8: memref<32x64xbf16, #tpu.memory_space<vmem>>, %arg9: memref<32x32xbf16, #tpu.memory_space<vmem>>, %arg10: memref<32x64xbf16, #tpu.memory_space<vmem>>, %arg11: memref<1x64xf32, #tpu.memory_space<vmem>>, %arg12: memref<64x32xbf16, #tpu.memory_space<vmem>>, %arg13: memref<7x32xf32, #tpu.memory_space<vmem>>, %arg14: memref<1x8x32xf32, #tpu.memory_space<vmem>>, %arg15: memref<1x4x8x8xf32, #tpu.memory_space<vmem>>, %arg16: memref<1x4x8x8xf32, #tpu.memory_space<vmem>>) attributes {dimension_semantics = [#tpu.dimension_semantics<parallel>], iteration_bounds = array<i64: 2>, scalar_prefetch = 0 : i64, scratch_operands = 0 : i64, tpu.core_type = #tpu.core_type<tc>, window_params = [{transform_indices = @transform_0, window_bounds = array<i64: 1, 8, 32>}, {transform_indices = @transform_1, window_bounds = array<i64: 1, 8, 32>}, {transform_indices = @transform_2, window_bounds = array<i64: 1, 8, 8>}, {transform_indices = @transform_3, window_bounds = array<i64: 1, 8, 8>}, {pipeline_mode = #tpu.pipeline_mode<synchronous>, transform_indices = @transform_4, window_bounds = array<i64: 32, 96>}, {pipeline_mode = #tpu.pipeline_mode<synchronous>, transform_indices = @transform_5, window_bounds = array<i64: 32, 32>}, {pipeline_mode = #tpu.pipeline_mode<synchronous>, transform_indices = @transform_6, window_bounds = array<i64: 32, 32>}, {pipeline_mode = #tpu.pipeline_mode<synchronous>, transform_indices = @transform_7, window_bounds = array<i64: 32, 64>}, {pipeline_mode = #tpu.pipeline_mode<synchronous>, transform_indices = @transform_8, window_bounds = array<i64: 32, 32>}, {pipeline_mode = #tpu.pipeline_mode<synchronous>, transform_indices = @transform_9, window_bounds = array<i64: 32, 64>}, {pipeline_mode = #tpu.pipeline_mode<synchronous>, transform_indices = @transform_10, window_bounds = array<i64: 1, 64>}, {pipeline_mode = #tpu.pipeline_mode<synchronous>, transform_indices = @transform_11, window_bounds = array<i64: 64, 32>}, {pipeline_mode = #tpu.pipeline_mode<synchronous>, transform_indices = @transform_12, window_bounds = array<i64: 7, 32>}, {transform_indices = @transform_13, window_bounds = array<i64: 1, 8, 32>}, {transform_indices = @transform_14, window_bounds = array<i64: 1, 4, 8, 8>}, {transform_indices = @transform_15, window_bounds = array<i64: 1, 4, 8, 8>}]} {
    %c0 = arith.constant 0 : index
    %c0_0 = arith.constant 0 : index
    %c0_1 = arith.constant 0 : index
    %0 = vector.load %arg1[%c0, %c0_0, %c0_1] : memref<1x8x32xbf16, #tpu.memory_space<vmem>>, vector<1x8x32xbf16>
    %1 = vector.shape_cast %0 : vector<1x8x32xbf16> to vector<8x32xbf16>
    %c0_2 = arith.constant 0 : index
    %c0_3 = arith.constant 0 : index
    %c0_4 = arith.constant 0 : index
    %2 = vector.load %arg2[%c0_2, %c0_3, %c0_4] : memref<1x8x32xbf16, #tpu.memory_space<vmem>>, vector<1x8x32xbf16>
    %3 = vector.shape_cast %2 : vector<1x8x32xbf16> to vector<8x32xbf16>
    %4 = arith.extf %1 : vector<8x32xbf16> to vector<8x32xf32>
    %c0_5 = arith.constant 0 : index
    %c0_6 = arith.constant 0 : index
    %5 = vector.load %arg13[%c0_5, %c0_6] : memref<7x32xf32, #tpu.memory_space<vmem>>, vector<7x32xf32>
    %6 = vector.extract_strided_slice %5 {offsets = [0, 0], sizes = [1, 32], strides = [1, 1]} : vector<7x32xf32> to vector<1x32xf32>
    %7 = vector.extract_strided_slice %5 {offsets = [1, 0], sizes = [1, 32], strides = [1, 1]} : vector<7x32xf32> to vector<1x32xf32>
    %8 = vector.extract_strided_slice %5 {offsets = [2, 0], sizes = [1, 32], strides = [1, 1]} : vector<7x32xf32> to vector<1x32xf32>
    %9 = vector.extract_strided_slice %5 {offsets = [3, 0], sizes = [1, 32], strides = [1, 1]} : vector<7x32xf32> to vector<1x32xf32>
    %10 = vector.extract_strided_slice %5 {offsets = [4, 0], sizes = [1, 32], strides = [1, 1]} : vector<7x32xf32> to vector<1x32xf32>
    %11 = vector.extract_strided_slice %5 {offsets = [5, 0], sizes = [1, 32], strides = [1, 1]} : vector<7x32xf32> to vector<1x32xf32>
    %12 = vector.extract_strided_slice %5 {offsets = [6, 0], sizes = [1, 32], strides = [1, 1]} : vector<7x32xf32> to vector<1x32xf32>
    %c0_7 = arith.constant 0 : index
    %c0_8 = arith.constant 0 : index
    %13 = vector.load %arg5[%c0_7, %c0_8] : memref<32x96xbf16, #tpu.memory_space<vmem>>, vector<32x96xbf16>
    %cst = arith.constant dense<0.000000e+00> : vector<8x96xf32>
    %14 = tpu.matmul %1, %13, %cst {dimension_numbers = #tpu.dot_dimension_numbers<[1], [0], [0], [1], [0, 0, 1, 1], [], []>} : vector<8x32xbf16>, vector<32x96xbf16>, vector<8x96xf32> -> vector<8x96xf32>
    %15 = vector.extract_strided_slice %14 {offsets = [0, 0], sizes = [8, 32], strides = [1, 1]} : vector<8x96xf32> to vector<8x32xf32>
    %16 = vector.extract_strided_slice %14 {offsets = [0, 32], sizes = [8, 64], strides = [1, 1]} : vector<8x96xf32> to vector<8x64xf32>
    %c0_9 = arith.constant 0 : index
    %c0_10 = arith.constant 0 : index
    %c0_11 = arith.constant 0 : index
    %17 = vector.load %arg3[%c0_9, %c0_10, %c0_11] : memref<1x8x8xbf16, #tpu.memory_space<vmem>>, vector<1x8x8xbf16>
    %18 = vector.shape_cast %17 : vector<1x8x8xbf16> to vector<8x8xbf16>
    %c0_12 = arith.constant 0 : index
    %c0_13 = arith.constant 0 : index
    %19 = vector.load %arg6[%c0_12, %c0_13] : memref<32x32xbf16, #tpu.memory_space<vmem>>, vector<32x32xbf16>
    %cst_14 = arith.constant 0.353553385 : f32
    %20 = vector.broadcast %cst_14 : f32 to vector<8x32xf32>
    %21 = arith.mulf %15, %20 : vector<8x32xf32>
    %22 = vector.extract_strided_slice %21 {offsets = [0, 0], sizes = [8, 8], strides = [1, 1]} : vector<8x32xf32> to vector<8x8xf32>
    %23 = vector.extract_strided_slice %21 {offsets = [0, 8], sizes = [8, 8], strides = [1, 1]} : vector<8x32xf32> to vector<8x8xf32>
    %24 = vector.extract_strided_slice %21 {offsets = [0, 16], sizes = [8, 8], strides = [1, 1]} : vector<8x32xf32> to vector<8x8xf32>
    %25 = vector.extract_strided_slice %21 {offsets = [0, 24], sizes = [8, 8], strides = [1, 1]} : vector<8x32xf32> to vector<8x8xf32>
    %26 = vector.shape_cast %22 : vector<8x8xf32> to vector<1x8x8xf32>
    %27 = vector.shape_cast %23 : vector<8x8xf32> to vector<1x8x8xf32>
    %28 = vector.shape_cast %24 : vector<8x8xf32> to vector<1x8x8xf32>
    %29 = vector.shape_cast %25 : vector<8x8xf32> to vector<1x8x8xf32>
    %30 = tpu.concatenate %26, %27, %28, %29 in 0 : vector<1x8x8xf32>, vector<1x8x8xf32>, vector<1x8x8xf32>, vector<1x8x8xf32> -> vector<4x8x8xf32>
    %31 = arith.truncf %30 : vector<4x8x8xf32> to vector<4x8x8xbf16>
    %32 = vector.extract_strided_slice %16 {offsets = [0, 0], sizes = [8, 32], strides = [1, 1]} : vector<8x64xf32> to vector<8x32xf32>
    %33 = vector.extract_strided_slice %32 {offsets = [0, 0], sizes = [8, 8], strides = [1, 1]} : vector<8x32xf32> to vector<8x8xf32>
    %34 = vector.extract_strided_slice %32 {offsets = [0, 8], sizes = [8, 8], strides = [1, 1]} : vector<8x32xf32> to vector<8x8xf32>
    %35 = vector.extract_strided_slice %32 {offsets = [0, 16], sizes = [8, 8], strides = [1, 1]} : vector<8x32xf32> to vector<8x8xf32>
    %36 = vector.extract_strided_slice %32 {offsets = [0, 24], sizes = [8, 8], strides = [1, 1]} : vector<8x32xf32> to vector<8x8xf32>
    %37 = vector.shape_cast %33 : vector<8x8xf32> to vector<1x8x8xf32>
    %38 = vector.shape_cast %34 : vector<8x8xf32> to vector<1x8x8xf32>
    %39 = vector.shape_cast %35 : vector<8x8xf32> to vector<1x8x8xf32>
    %40 = vector.shape_cast %36 : vector<8x8xf32> to vector<1x8x8xf32>
    %41 = tpu.concatenate %37, %38, %39, %40 in 0 : vector<1x8x8xf32>, vector<1x8x8xf32>, vector<1x8x8xf32>, vector<1x8x8xf32> -> vector<4x8x8xf32>
    %42 = arith.truncf %41 : vector<4x8x8xf32> to vector<4x8x8xbf16>
    %43 = vector.extract_strided_slice %16 {offsets = [0, 32], sizes = [8, 32], strides = [1, 1]} : vector<8x64xf32> to vector<8x32xf32>
    %44 = vector.extract_strided_slice %43 {offsets = [0, 0], sizes = [8, 8], strides = [1, 1]} : vector<8x32xf32> to vector<8x8xf32>
    %45 = vector.extract_strided_slice %43 {offsets = [0, 8], sizes = [8, 8], strides = [1, 1]} : vector<8x32xf32> to vector<8x8xf32>
    %46 = vector.extract_strided_slice %43 {offsets = [0, 16], sizes = [8, 8], strides = [1, 1]} : vector<8x32xf32> to vector<8x8xf32>
    %47 = vector.extract_strided_slice %43 {offsets = [0, 24], sizes = [8, 8], strides = [1, 1]} : vector<8x32xf32> to vector<8x8xf32>
    %48 = vector.shape_cast %44 : vector<8x8xf32> to vector<1x8x8xf32>
    %49 = vector.shape_cast %45 : vector<8x8xf32> to vector<1x8x8xf32>
    %50 = vector.shape_cast %46 : vector<8x8xf32> to vector<1x8x8xf32>
    %51 = vector.shape_cast %47 : vector<8x8xf32> to vector<1x8x8xf32>
    %52 = tpu.concatenate %48, %49, %50, %51 in 0 : vector<1x8x8xf32>, vector<1x8x8xf32>, vector<1x8x8xf32>, vector<1x8x8xf32> -> vector<4x8x8xf32>
    %53 = arith.truncf %52 : vector<4x8x8xf32> to vector<4x8x8xbf16>
    "tpu.trace_start"() <{level = 10 : i32, message = "hqe,hke->hqk"}> : () -> ()
    %cst_15 = arith.constant dense<0.000000e+00> : vector<4x8x8xf32>
    %54 = tpu.matmul %31, %42, %cst_15 {dimension_numbers = #tpu.dot_dimension_numbers<[2], [2], [1], [1], [0, 0, 0, 1, 1, 1], [0], [0]>} : vector<4x8x8xbf16>, vector<4x8x8xbf16>, vector<4x8x8xf32> -> vector<4x8x8xf32>
    "tpu.trace_stop"() : () -> ()
    %55 = arith.extf %18 : vector<8x8xbf16> to vector<8x8xf32>
    %56 = vector.shape_cast %55 : vector<8x8xf32> to vector<1x8x8xf32>
    %57 = vector.broadcast %56 : vector<1x8x8xf32> to vector<4x8x8xf32>
    %58 = arith.addf %54, %57 : vector<4x8x8xf32>
    %cst_16 = arith.constant dense<0xFF800000> : vector<4x8xf32>
    %59 = vector.multi_reduction <maximumf>, %58, %cst_16 [2] : vector<4x8x8xf32> to vector<4x8xf32>
    %60 = vector.shape_cast %59 : vector<4x8xf32> to vector<4x8x1xf32>
    %61 = vector.broadcast %60 : vector<4x8x1xf32> to vector<4x8x8xf32>
    %62 = arith.subf %58, %61 : vector<4x8x8xf32>
    %63 = math.exp %62 : vector<4x8x8xf32>
    %cst_17 = arith.constant dense<0.000000e+00> : vector<4x8xf32>
    %64 = vector.multi_reduction <add>, %63, %cst_17 [2] : vector<4x8x8xf32> to vector<4x8xf32>
    %65 = vector.shape_cast %64 : vector<4x8xf32> to vector<4x8x1xf32>
    %66 = vector.broadcast %65 : vector<4x8x1xf32> to vector<4x8x8xf32>
    %67 = arith.divf %63, %66 : vector<4x8x8xf32>
    %68 = arith.truncf %67 : vector<4x8x8xf32> to vector<4x8x8xbf16>
    "tpu.trace_start"() <{level = 10 : i32, message = "hqk,hke->hqe"}> : () -> ()
    %cst_18 = arith.constant dense<0.000000e+00> : vector<4x8x8xf32>
    %69 = tpu.matmul %68, %53, %cst_18 {dimension_numbers = #tpu.dot_dimension_numbers<[2], [1], [1], [2], [0, 0, 0, 1, 1, 2], [0], [0]>} : vector<4x8x8xbf16>, vector<4x8x8xbf16>, vector<4x8x8xf32> -> vector<4x8x8xf32>
    "tpu.trace_stop"() : () -> ()
    %70 = vector.extract_strided_slice %69 {offsets = [0, 0, 0], sizes = [1, 8, 8], strides = [1, 1, 1]} : vector<4x8x8xf32> to vector<1x8x8xf32>
    %71 = vector.shape_cast %70 : vector<1x8x8xf32> to vector<8x8xf32>
    %72 = vector.extract_strided_slice %69 {offsets = [1, 0, 0], sizes = [1, 8, 8], strides = [1, 1, 1]} : vector<4x8x8xf32> to vector<1x8x8xf32>
    %73 = vector.shape_cast %72 : vector<1x8x8xf32> to vector<8x8xf32>
    %74 = vector.extract_strided_slice %69 {offsets = [2, 0, 0], sizes = [1, 8, 8], strides = [1, 1, 1]} : vector<4x8x8xf32> to vector<1x8x8xf32>
    %75 = vector.shape_cast %74 : vector<1x8x8xf32> to vector<8x8xf32>
    %76 = vector.extract_strided_slice %69 {offsets = [3, 0, 0], sizes = [1, 8, 8], strides = [1, 1, 1]} : vector<4x8x8xf32> to vector<1x8x8xf32>
    %77 = vector.shape_cast %76 : vector<1x8x8xf32> to vector<8x8xf32>
    %78 = tpu.concatenate %71, %73, %75, %77 in 1 : vector<8x8xf32>, vector<8x8xf32>, vector<8x8xf32>, vector<8x8xf32> -> vector<8x32xf32>
    %79 = arith.truncf %78 : vector<8x32xf32> to vector<8x32xbf16>
    %cst_19 = arith.constant dense<0.000000e+00> : vector<8x32xf32>
    %80 = tpu.matmul %79, %19, %cst_19 {dimension_numbers = #tpu.dot_dimension_numbers<[1], [0], [0], [1], [0, 0, 1, 1], [], []>} : vector<8x32xbf16>, vector<32x32xbf16>, vector<8x32xf32> -> vector<8x32xf32>
    %81 = arith.addf %80, %4 : vector<8x32xf32>
    %cst_20 = arith.constant dense<0.000000e+00> : vector<8xf32>
    %82 = vector.multi_reduction <add>, %81, %cst_20 [1] : vector<8x32xf32> to vector<8xf32>
    %83 = vector.shape_cast %82 : vector<8xf32> to vector<8x1xf32>
    %cst_21 = arith.constant 3.200000e+01 : f32
    %84 = vector.broadcast %cst_21 : f32 to vector<8x1xf32>
    %85 = arith.divf %83, %84 : vector<8x1xf32>
    %86 = vector.broadcast %85 : vector<8x1xf32> to vector<8x32xf32>
    %87 = arith.subf %81, %86 : vector<8x32xf32>
    %88 = arith.mulf %87, %87 : vector<8x32xf32>
    %cst_22 = arith.constant dense<0.000000e+00> : vector<8xf32>
    %89 = vector.multi_reduction <add>, %88, %cst_22 [1] : vector<8x32xf32> to vector<8xf32>
    %90 = vector.shape_cast %89 : vector<8xf32> to vector<8x1xf32>
    %cst_23 = arith.constant 3.200000e+01 : f32
    %91 = vector.broadcast %cst_23 : f32 to vector<8x1xf32>
    %92 = arith.divf %90, %91 : vector<8x1xf32>
    %93 = vector.broadcast %85 : vector<8x1xf32> to vector<8x32xf32>
    %94 = arith.subf %81, %93 : vector<8x32xf32>
    %cst_24 = arith.constant 9.99999997E-7 : f32
    %95 = vector.broadcast %cst_24 : f32 to vector<8x1xf32>
    %96 = arith.addf %92, %95 : vector<8x1xf32>
    %97 = math.rsqrt %96 : vector<8x1xf32>
    %98 = vector.broadcast %97 : vector<8x1xf32> to vector<8x32xf32>
    %99 = arith.mulf %94, %98 : vector<8x32xf32>
    %100 = vector.broadcast %6 : vector<1x32xf32> to vector<8x32xf32>
    %101 = arith.mulf %99, %100 : vector<8x32xf32>
    %102 = vector.broadcast %7 : vector<1x32xf32> to vector<8x32xf32>
    %103 = arith.addf %101, %102 : vector<8x32xf32>
    %c0_25 = arith.constant 0 : index
    %c0_26 = arith.constant 0 : index
    %c0_27 = arith.constant 0 : index
    %c0_28 = arith.constant 0 : index
    %104 = vector.load %arg15[%c0_25, %c0_26, %c0_27, %c0_28] : memref<1x4x8x8xf32, #tpu.memory_space<vmem>>, vector<1x4x8x8xf32>
    %105 = vector.shape_cast %104 : vector<1x4x8x8xf32> to vector<4x8x8xf32>
    %106 = vector.shape_cast %67 : vector<4x8x8xf32> to vector<1x4x8x8xf32>
    tpu.vector_store %arg15[%c0_25, %c0_26, %c0_27, %c0_28], %106 {strides = array<i32>} : memref<1x4x8x8xf32, #tpu.memory_space<vmem>>, vector<1x4x8x8xf32>,
    %107 = arith.truncf %103 : vector<8x32xf32> to vector<8x32xbf16>
    %c0_29 = arith.constant 0 : index
    %c0_30 = arith.constant 0 : index
    %108 = vector.load %arg7[%c0_29, %c0_30] : memref<32x32xbf16, #tpu.memory_space<vmem>>, vector<32x32xbf16>
    %cst_31 = arith.constant dense<0.000000e+00> : vector<8x32xf32>
    %109 = tpu.matmul %107, %108, %cst_31 {dimension_numbers = #tpu.dot_dimension_numbers<[1], [0], [0], [1], [0, 0, 1, 1], [], []>} : vector<8x32xbf16>, vector<32x32xbf16>, vector<8x32xf32> -> vector<8x32xf32>
    %c0_32 = arith.constant 0 : index
    %c0_33 = arith.constant 0 : index
    %110 = vector.load %arg8[%c0_32, %c0_33] : memref<32x64xbf16, #tpu.memory_space<vmem>>, vector<32x64xbf16>
    %cst_34 = arith.constant dense<0.000000e+00> : vector<8x64xf32>
    %111 = tpu.matmul %3, %110, %cst_34 {dimension_numbers = #tpu.dot_dimension_numbers<[1], [0], [0], [1], [0, 0, 1, 1], [], []>} : vector<8x32xbf16>, vector<32x64xbf16>, vector<8x64xf32> -> vector<8x64xf32>
    %c0_35 = arith.constant 0 : index
    %c0_36 = arith.constant 0 : index
    %c0_37 = arith.constant 0 : index
    %112 = vector.load %arg4[%c0_35, %c0_36, %c0_37] : memref<1x8x8xbf16, #tpu.memory_space<vmem>>, vector<1x8x8xbf16>
    %113 = vector.shape_cast %112 : vector<1x8x8xbf16> to vector<8x8xbf16>
    %c0_38 = arith.constant 0 : index
    %c0_39 = arith.constant 0 : index
    %114 = vector.load %arg9[%c0_38, %c0_39] : memref<32x32xbf16, #tpu.memory_space<vmem>>, vector<32x32xbf16>
    %cst_40 = arith.constant 0.353553385 : f32
    %115 = vector.broadcast %cst_40 : f32 to vector<8x32xf32>
    %116 = arith.mulf %109, %115 : vector<8x32xf32>
    %117 = vector.extract_strided_slice %116 {offsets = [0, 0], sizes = [8, 8], strides = [1, 1]} : vector<8x32xf32> to vector<8x8xf32>
    %118 = vector.extract_strided_slice %116 {offsets = [0, 8], sizes = [8, 8], strides = [1, 1]} : vector<8x32xf32> to vector<8x8xf32>
    %119 = vector.extract_strided_slice %116 {offsets = [0, 16], sizes = [8, 8], strides = [1, 1]} : vector<8x32xf32> to vector<8x8xf32>
    %120 = vector.extract_strided_slice %116 {offsets = [0, 24], sizes = [8, 8], strides = [1, 1]} : vector<8x32xf32> to vector<8x8xf32>
    %121 = vector.shape_cast %117 : vector<8x8xf32> to vector<1x8x8xf32>
    %122 = vector.shape_cast %118 : vector<8x8xf32> to vector<1x8x8xf32>
    %123 = vector.shape_cast %119 : vector<8x8xf32> to vector<1x8x8xf32>
    %124 = vector.shape_cast %120 : vector<8x8xf32> to vector<1x8x8xf32>
    %125 = tpu.concatenate %121, %122, %123, %124 in 0 : vector<1x8x8xf32>, vector<1x8x8xf32>, vector<1x8x8xf32>, vector<1x8x8xf32> -> vector<4x8x8xf32>
    %126 = arith.truncf %125 : vector<4x8x8xf32> to vector<4x8x8xbf16>
    %127 = vector.extract_strided_slice %111 {offsets = [0, 0], sizes = [8, 32], strides = [1, 1]} : vector<8x64xf32> to vector<8x32xf32>
    %128 = vector.extract_strided_slice %127 {offsets = [0, 0], sizes = [8, 8], strides = [1, 1]} : vector<8x32xf32> to vector<8x8xf32>
    %129 = vector.extract_strided_slice %127 {offsets = [0, 8], sizes = [8, 8], strides = [1, 1]} : vector<8x32xf32> to vector<8x8xf32>
    %130 = vector.extract_strided_slice %127 {offsets = [0, 16], sizes = [8, 8], strides = [1, 1]} : vector<8x32xf32> to vector<8x8xf32>
    %131 = vector.extract_strided_slice %127 {offsets = [0, 24], sizes = [8, 8], strides = [1, 1]} : vector<8x32xf32> to vector<8x8xf32>
    %132 = vector.shape_cast %128 : vector<8x8xf32> to vector<1x8x8xf32>
    %133 = vector.shape_cast %129 : vector<8x8xf32> to vector<1x8x8xf32>
    %134 = vector.shape_cast %130 : vector<8x8xf32> to vector<1x8x8xf32>
    %135 = vector.shape_cast %131 : vector<8x8xf32> to vector<1x8x8xf32>
    %136 = tpu.concatenate %132, %133, %134, %135 in 0 : vector<1x8x8xf32>, vector<1x8x8xf32>, vector<1x8x8xf32>, vector<1x8x8xf32> -> vector<4x8x8xf32>
    %137 = arith.truncf %136 : vector<4x8x8xf32> to vector<4x8x8xbf16>
    %138 = vector.extract_strided_slice %111 {offsets = [0, 32], sizes = [8, 32], strides = [1, 1]} : vector<8x64xf32> to vector<8x32xf32>
    %139 = vector.extract_strided_slice %138 {offsets = [0, 0], sizes = [8, 8], strides = [1, 1]} : vector<8x32xf32> to vector<8x8xf32>
    %140 = vector.extract_strided_slice %138 {offsets = [0, 8], sizes = [8, 8], strides = [1, 1]} : vector<8x32xf32> to vector<8x8xf32>
    %141 = vector.extract_strided_slice %138 {offsets = [0, 16], sizes = [8, 8], strides = [1, 1]} : vector<8x32xf32> to vector<8x8xf32>
    %142 = vector.extract_strided_slice %138 {offsets = [0, 24], sizes = [8, 8], strides = [1, 1]} : vector<8x32xf32> to vector<8x8xf32>
    %143 = vector.shape_cast %139 : vector<8x8xf32> to vector<1x8x8xf32>
    %144 = vector.shape_cast %140 : vector<8x8xf32> to vector<1x8x8xf32>
    %145 = vector.shape_cast %141 : vector<8x8xf32> to vector<1x8x8xf32>
    %146 = vector.shape_cast %142 : vector<8x8xf32> to vector<1x8x8xf32>
    %147 = tpu.concatenate %143, %144, %145, %146 in 0 : vector<1x8x8xf32>, vector<1x8x8xf32>, vector<1x8x8xf32>, vector<1x8x8xf32> -> vector<4x8x8xf32>
    %148 = arith.truncf %147 : vector<4x8x8xf32> to vector<4x8x8xbf16>
    "tpu.trace_start"() <{level = 10 : i32, message = "hqe,hke->hqk"}> : () -> ()
    %cst_41 = arith.constant dense<0.000000e+00> : vector<4x8x8xf32>
    %149 = tpu.matmul %126, %137, %cst_41 {dimension_numbers = #tpu.dot_dimension_numbers<[2], [2], [1], [1], [0, 0, 0, 1, 1, 1], [0], [0]>} : vector<4x8x8xbf16>, vector<4x8x8xbf16>, vector<4x8x8xf32> -> vector<4x8x8xf32>
    "tpu.trace_stop"() : () -> ()
    %150 = arith.extf %113 : vector<8x8xbf16> to vector<8x8xf32>
    %151 = vector.shape_cast %150 : vector<8x8xf32> to vector<1x8x8xf32>
    %152 = vector.broadcast %151 : vector<1x8x8xf32> to vector<4x8x8xf32>
    %153 = arith.addf %149, %152 : vector<4x8x8xf32>
    %cst_42 = arith.constant dense<0xFF800000> : vector<4x8xf32>
    %154 = vector.multi_reduction <maximumf>, %153, %cst_42 [2] : vector<4x8x8xf32> to vector<4x8xf32>
    %155 = vector.shape_cast %154 : vector<4x8xf32> to vector<4x8x1xf32>
    %156 = vector.broadcast %155 : vector<4x8x1xf32> to vector<4x8x8xf32>
    %157 = arith.subf %153, %156 : vector<4x8x8xf32>
    %158 = math.exp %157 : vector<4x8x8xf32>
    %cst_43 = arith.constant dense<0.000000e+00> : vector<4x8xf32>
    %159 = vector.multi_reduction <add>, %158, %cst_43 [2] : vector<4x8x8xf32> to vector<4x8xf32>
    %160 = vector.shape_cast %159 : vector<4x8xf32> to vector<4x8x1xf32>
    %161 = vector.broadcast %160 : vector<4x8x1xf32> to vector<4x8x8xf32>
    %162 = arith.divf %158, %161 : vector<4x8x8xf32>
    %163 = arith.truncf %162 : vector<4x8x8xf32> to vector<4x8x8xbf16>
    "tpu.trace_start"() <{level = 10 : i32, message = "hqk,hke->hqe"}> : () -> ()
    %cst_44 = arith.constant dense<0.000000e+00> : vector<4x8x8xf32>
    %164 = tpu.matmul %163, %148, %cst_44 {dimension_numbers = #tpu.dot_dimension_numbers<[2], [1], [1], [2], [0, 0, 0, 1, 1, 2], [0], [0]>} : vector<4x8x8xbf16>, vector<4x8x8xbf16>, vector<4x8x8xf32> -> vector<4x8x8xf32>
    "tpu.trace_stop"() : () -> ()
    %165 = vector.extract_strided_slice %164 {offsets = [0, 0, 0], sizes = [1, 8, 8], strides = [1, 1, 1]} : vector<4x8x8xf32> to vector<1x8x8xf32>
    %166 = vector.shape_cast %165 : vector<1x8x8xf32> to vector<8x8xf32>
    %167 = vector.extract_strided_slice %164 {offsets = [1, 0, 0], sizes = [1, 8, 8], strides = [1, 1, 1]} : vector<4x8x8xf32> to vector<1x8x8xf32>
    %168 = vector.shape_cast %167 : vector<1x8x8xf32> to vector<8x8xf32>
    %169 = vector.extract_strided_slice %164 {offsets = [2, 0, 0], sizes = [1, 8, 8], strides = [1, 1, 1]} : vector<4x8x8xf32> to vector<1x8x8xf32>
    %170 = vector.shape_cast %169 : vector<1x8x8xf32> to vector<8x8xf32>
    %171 = vector.extract_strided_slice %164 {offsets = [3, 0, 0], sizes = [1, 8, 8], strides = [1, 1, 1]} : vector<4x8x8xf32> to vector<1x8x8xf32>
    %172 = vector.shape_cast %171 : vector<1x8x8xf32> to vector<8x8xf32>
    %173 = tpu.concatenate %166, %168, %170, %172 in 1 : vector<8x8xf32>, vector<8x8xf32>, vector<8x8xf32>, vector<8x8xf32> -> vector<8x32xf32>
    %174 = arith.truncf %173 : vector<8x32xf32> to vector<8x32xbf16>
    %cst_45 = arith.constant dense<0.000000e+00> : vector<8x32xf32>
    %175 = tpu.matmul %174, %114, %cst_45 {dimension_numbers = #tpu.dot_dimension_numbers<[1], [0], [0], [1], [0, 0, 1, 1], [], []>} : vector<8x32xbf16>, vector<32x32xbf16>, vector<8x32xf32> -> vector<8x32xf32>
    %176 = arith.addf %175, %103 : vector<8x32xf32>
    %cst_46 = arith.constant dense<0.000000e+00> : vector<8xf32>
    %177 = vector.multi_reduction <add>, %176, %cst_46 [1] : vector<8x32xf32> to vector<8xf32>
    %178 = vector.shape_cast %177 : vector<8xf32> to vector<8x1xf32>
    %cst_47 = arith.constant 3.200000e+01 : f32
    %179 = vector.broadcast %cst_47 : f32 to vector<8x1xf32>
    %180 = arith.divf %178, %179 : vector<8x1xf32>
    %181 = vector.broadcast %180 : vector<8x1xf32> to vector<8x32xf32>
    %182 = arith.subf %176, %181 : vector<8x32xf32>
    %183 = arith.mulf %182, %182 : vector<8x32xf32>
    %cst_48 = arith.constant dense<0.000000e+00> : vector<8xf32>
    %184 = vector.multi_reduction <add>, %183, %cst_48 [1] : vector<8x32xf32> to vector<8xf32>
    %185 = vector.shape_cast %184 : vector<8xf32> to vector<8x1xf32>
    %cst_49 = arith.constant 3.200000e+01 : f32
    %186 = vector.broadcast %cst_49 : f32 to vector<8x1xf32>
    %187 = arith.divf %185, %186 : vector<8x1xf32>
    %188 = vector.broadcast %180 : vector<8x1xf32> to vector<8x32xf32>
    %189 = arith.subf %176, %188 : vector<8x32xf32>
    %cst_50 = arith.constant 9.99999997E-7 : f32
    %190 = vector.broadcast %cst_50 : f32 to vector<8x1xf32>
    %191 = arith.addf %187, %190 : vector<8x1xf32>
    %192 = math.rsqrt %191 : vector<8x1xf32>
    %193 = vector.broadcast %192 : vector<8x1xf32> to vector<8x32xf32>
    %194 = arith.mulf %189, %193 : vector<8x32xf32>
    %195 = vector.broadcast %8 : vector<1x32xf32> to vector<8x32xf32>
    %196 = arith.mulf %194, %195 : vector<8x32xf32>
    %197 = vector.broadcast %9 : vector<1x32xf32> to vector<8x32xf32>
    %198 = arith.addf %196, %197 : vector<8x32xf32>
    %c0_51 = arith.constant 0 : index
    %c0_52 = arith.constant 0 : index
    %c0_53 = arith.constant 0 : index
    %c0_54 = arith.constant 0 : index
    %199 = vector.load %arg16[%c0_51, %c0_52, %c0_53, %c0_54] : memref<1x4x8x8xf32, #tpu.memory_space<vmem>>, vector<1x4x8x8xf32>
    %200 = vector.shape_cast %199 : vector<1x4x8x8xf32> to vector<4x8x8xf32>
    %201 = vector.shape_cast %162 : vector<4x8x8xf32> to vector<1x4x8x8xf32>
    tpu.vector_store %arg16[%c0_51, %c0_52, %c0_53, %c0_54], %201 {strides = array<i32>} : memref<1x4x8x8xf32, #tpu.memory_space<vmem>>, vector<1x4x8x8xf32>,
    %202 = arith.truncf %198 : vector<8x32xf32> to vector<8x32xbf16>
    %c0_55 = arith.constant 0 : index
    %c0_56 = arith.constant 0 : index
    %203 = vector.load %arg10[%c0_55, %c0_56] : memref<32x64xbf16, #tpu.memory_space<vmem>>, vector<32x64xbf16>
    %cst_57 = arith.constant dense<0.000000e+00> : vector<8x64xf32>
    %204 = tpu.matmul %202, %203, %cst_57 {dimension_numbers = #tpu.dot_dimension_numbers<[1], [0], [0], [1], [0, 0, 1, 1], [], []>} : vector<8x32xbf16>, vector<32x64xbf16>, vector<8x64xf32> -> vector<8x64xf32>
    %c0_58 = arith.constant 0 : index
    %c0_59 = arith.constant 0 : index
    %205 = vector.load %arg11[%c0_58, %c0_59] : memref<1x64xf32, #tpu.memory_space<vmem>>, vector<1x64xf32>
    %206 = vector.broadcast %205 : vector<1x64xf32> to vector<8x64xf32>
    %207 = arith.addf %204, %206 : vector<8x64xf32>
    %cst_60 = arith.constant 0.000000e+00 : f32
    %208 = vector.broadcast %cst_60 : f32 to vector<8x64xf32>
    %209 = arith.maximumf %207, %208 : vector<8x64xf32>
    %210 = arith.truncf %209 : vector<8x64xf32> to vector<8x64xbf16>
    %c0_61 = arith.constant 0 : index
    %c0_62 = arith.constant 0 : index
    %211 = vector.load %arg12[%c0_61, %c0_62] : memref<64x32xbf16, #tpu.memory_space<vmem>>, vector<64x32xbf16>
    %cst_63 = arith.constant dense<0.000000e+00> : vector<8x32xf32>
    %212 = tpu.matmul %210, %211, %cst_63 {dimension_numbers = #tpu.dot_dimension_numbers<[1], [0], [0], [1], [0, 0, 1, 1], [], []>} : vector<8x64xbf16>, vector<64x32xbf16>, vector<8x32xf32> -> vector<8x32xf32>
    %213 = vector.broadcast %12 : vector<1x32xf32> to vector<8x32xf32>
    %214 = arith.addf %212, %213 : vector<8x32xf32>
    %215 = arith.addf %214, %198 : vector<8x32xf32>
    %cst_64 = arith.constant dense<0.000000e+00> : vector<8xf32>
    %216 = vector.multi_reduction <add>, %215, %cst_64 [1] : vector<8x32xf32> to vector<8xf32>
    %217 = vector.shape_cast %216 : vector<8xf32> to vector<8x1xf32>
    %cst_65 = arith.constant 3.200000e+01 : f32
    %218 = vector.broadcast %cst_65 : f32 to vector<8x1xf32>
    %219 = arith.divf %217, %218 : vector<8x1xf32>
    %220 = vector.broadcast %219 : vector<8x1xf32> to vector<8x32xf32>
    %221 = arith.subf %215, %220 : vector<8x32xf32>
    %222 = arith.mulf %221, %221 : vector<8x32xf32>
    %cst_66 = arith.constant dense<0.000000e+00> : vector<8xf32>
    %223 = vector.multi_reduction <add>, %222, %cst_66 [1] : vector<8x32xf32> to vector<8xf32>
    %224 = vector.shape_cast %223 : vector<8xf32> to vector<8x1xf32>
    %cst_67 = arith.constant 3.200000e+01 : f32
    %225 = vector.broadcast %cst_67 : f32 to vector<8x1xf32>
    %226 = arith.divf %224, %225 : vector<8x1xf32>
    %227 = vector.broadcast %219 : vector<8x1xf32> to vector<8x32xf32>
    %228 = arith.subf %215, %227 : vector<8x32xf32>
    %cst_68 = arith.constant 9.99999997E-7 : f32
    %229 = vector.broadcast %cst_68 : f32 to vector<8x1xf32>
    %230 = arith.addf %226, %229 : vector<8x1xf32>
    %231 = math.rsqrt %230 : vector<8x1xf32>
    %232 = vector.broadcast %231 : vector<8x1xf32> to vector<8x32xf32>
    %233 = arith.mulf %228, %232 : vector<8x32xf32>
    %234 = vector.broadcast %10 : vector<1x32xf32> to vector<8x32xf32>
    %235 = arith.mulf %233, %234 : vector<8x32xf32>
    %236 = vector.broadcast %11 : vector<1x32xf32> to vector<8x32xf32>
    %237 = arith.addf %235, %236 : vector<8x32xf32>
    %c0_69 = arith.constant 0 : index
    %c0_70 = arith.constant 0 : index
    %c0_71 = arith.constant 0 : index
    %238 = vector.load %arg14[%c0_69, %c0_70, %c0_71] : memref<1x8x32xf32, #tpu.memory_space<vmem>>, vector<1x8x32xf32>
    %239 = vector.shape_cast %238 : vector<1x8x32xf32> to vector<8x32xf32>
    %240 = vector.shape_cast %237 : vector<8x32xf32> to vector<1x8x32xf32>
    tpu.vector_store %arg14[%c0_69, %c0_70, %c0_71], %240 {strides = array<i32>} : memref<1x8x32xf32, #tpu.memory_space<vmem>>, vector<1x8x32xf32>,
    return
  }
  func.func @transform_0(%arg0: i32) -> (i32, i32, i32) {
    %c0_i32 = arith.constant 0 : i32
    %c0_i32_0 = arith.constant 0 : i32
    %c0_i32_1 = arith.constant 0 : i32
    return %arg0, %c0_i32, %c0_i32_0 : i32, i32, i32
  }
  func.func @transform_1(%arg0: i32) -> (i32, i32, i32) {
    %c0_i32 = arith.constant 0 : i32
    %c0_i32_0 = arith.constant 0 : i32
    %c0_i32_1 = arith.constant 0 : i32
    return %arg0, %c0_i32, %c0_i32_0 : i32, i32, i32
  }
  func.func @transform_2(%arg0: i32) -> (i32, i32, i32) {
    %c0_i32 = arith.constant 0 : i32
    %c0_i32_0 = arith.constant 0 : i32
    %c0_i32_1 = arith.constant 0 : i32
    return %arg0, %c0_i32, %c0_i32_0 : i32, i32, i32
  }
  func.func @transform_3(%arg0: i32) -> (i32, i32, i32) {
    %c0_i32 = arith.constant 0 : i32
    %c0_i32_0 = arith.constant 0 : i32
    %c0_i32_1 = arith.constant 0 : i32
    return %arg0, %c0_i32, %c0_i32_0 : i32, i32, i32
  }
  func.func @transform_4(%arg0: i32) -> (i32, i32) {
    %c0_i32 = arith.constant 0 : i32
    %c0_i32_0 = arith.constant 0 : i32
    %c0_i32_1 = arith.constant 0 : i32
    return %c0_i32, %c0_i32_0 : i32, i32
  }
  func.func @transform_5(%arg0: i32) -> (i32, i32) {
    %c0_i32 = arith.constant 0 : i32
    %c0_i32_0 = arith.constant 0 : i32
    %c0_i32_1 = arith.constant 0 : i32
    return %c0_i32, %c0_i32_0 : i32, i32
  }
  func.func @transform_6(%arg0: i32) -> (i32, i32) {
    %c0_i32 = arith.constant 0 : i32
    %c0_i32_0 = arith.constant 0 : i32
    %c0_i32_1 = arith.constant 0 : i32
    return %c0_i32, %c0_i32_0 : i32, i32
  }
  func.func @transform_7(%arg0: i32) -> (i32, i32) {
    %c0_i32 = arith.constant 0 : i32
    %c0_i32_0 = arith.constant 0 : i32
    %c0_i32_1 = arith.constant 0 : i32
    return %c0_i32, %c0_i32_0 : i32, i32
  }
  func.func @transform_8(%arg0: i32) -> (i32, i32) {
    %c0_i32 = arith.constant 0 : i32
    %c0_i32_0 = arith.constant 0 : i32
    %c0_i32_1 = arith.constant 0 : i32
    return %c0_i32, %c0_i32_0 : i32, i32
  }
  func.func @transform_9(%arg0: i32) -> (i32, i32) {
    %c0_i32 = arith.constant 0 : i32
    %c0_i32_0 = arith.constant 0 : i32
    %c0_i32_1 = arith.constant 0 : i32
    return %c0_i32, %c0_i32_0 : i32, i32
  }
  func.func @transform_10(%arg0: i32) -> (i32, i32) {
    %c0_i32 = arith.constant 0 : i32
    %c0_i32_0 = arith.constant 0 : i32
    %c0_i32_1 = arith.constant 0 : i32
    return %c0_i32, %c0_i32_0 : i32, i32
  }
  func.func @transform_11(%arg0: i32) -> (i32, i32) {
    %c0_i32 = arith.constant 0 : i32
    %c0_i32_0 = arith.constant 0 : i32
    %c0_i32_1 = arith.constant 0 : i32
    return %c0_i32, %c0_i32_0 : i32, i32
  }
  func.func @transform_12(%arg0: i32) -> (i32, i32) {
    %c0_i32 = arith.constant 0 : i32
    %c0_i32_0 = arith.constant 0 : i32
    %c0_i32_1 = arith.constant 0 : i32
    return %c0_i32, %c0_i32_0 : i32, i32
  }
  func.func @transform_13(%arg0: i32) -> (i32, i32, i32) {
    %c0_i32 = arith.constant 0 : i32
    %c0_i32_0 = arith.constant 0 : i32
    %c0_i32_1 = arith.constant 0 : i32
    return %arg0, %c0_i32, %c0_i32_0 : i32, i32, i32
  }
  func.func @transform_14(%arg0: i32) -> (i32, i32, i32, i32) {
    %c0_i32 = arith.constant 0 : i32
    %c0_i32_0 = arith.constant 0 : i32
    %c0_i32_1 = arith.constant 0 : i32
    %c0_i32_2 = arith.constant 0 : i32
    return %arg0, %c0_i32, %c0_i32_0, %c0_i32_1 : i32, i32, i32, i32
  }
  func.func @transform_15(%arg0: i32) -> (i32, i32, i32, i32) {
    %c0_i32 = arith.constant 0 : i32
    %c0_i32_0 = arith.constant 0 : i32
    %c0_i32_1 = arith.constant 0 : i32
    %c0_i32_2 = arith.constant 0 : i32
    return %arg0, %c0_i32, %c0_i32_0, %c0_i32_1 : i32, i32, i32, i32
  }
}

</mosaic_0001>

<bundles_post_ra>
// kernel: decoder_layer.1
= control target key start
LH: loop header
LB: loop body
LE: loop exit
PB: predicated region body
PF: predicated region fallthrough
CT: control target
= control target key end

     0   :  { %s3385_s0 = inlined_call_operand.vmem [shape: bf16[2,8,32], index: 0, kind: input, shape index: {}]   ;;  %s3386_s1 = inlined_call_operand.vmem [shape: bf16[2,8,32], index: 1, kind: input, shape index: {}]   ;;  %s3387_s2 = inlined_call_operand.vmem [shape: bf16[2,8,8], index: 2, kind: input, shape index: {}]   ;;  %s3388_s3 = inlined_call_operand.vmem [shape: bf16[2,8,8], index: 3, kind: input, shape index: {}]   ;;  %s3389_s4 = inlined_call_operand.vmem [shape: bf16[32,96], index: 4, kind: input, shape index: {}]   ;;  %s3390_s5 = inlined_call_operand.vmem [shape: bf16[32,32], index: 5, kind: input, shape index: {}]   ;;  %s3391_s6 = inlined_call_operand.vmem [shape: bf16[32,32], index: 6, kind: input, shape index: {}]   ;;  %s3392_s7 = inlined_call_operand.vmem [shape: bf16[32,64], index: 7, kind: input, shape index: {}]   ;;  %s3393_s8 = inlined_call_operand.vmem [shape: bf16[32,32], index: 8, kind: input, shape index: {}]   ;;  %s3394_s9 = inlined_call_operand.vmem [shape: bf16[32,64], index: 9, kind: input, shape index: {}]   ;;  %s3395_s10 = inlined_call_operand.vmem [shape: f32[1,64], index: 10, kind: input, shape index: {}]   ;;  %s3396_s11 = inlined_call_operand.vmem [shape: bf16[64,32], index: 11, kind: input, shape index: {}]   ;;  %s3397_s12 = inlined_call_operand.vmem [shape: f32[7,32], index: 12, kind: input, shape index: {}]   ;;  %s3398_s13 = inlined_call_operand.hbm [shape: f32[2,8,32], index: 13, kind: output, shape index: {0}]   ;;  %s3399_s14 = inlined_call_operand.hbm [shape: f32[2,4,8,8], index: 14, kind: output, shape index: {1}]   ;;  %s3400_s15 = inlined_call_operand.hbm [shape: f32[2,4,8,8], index: 15, kind: output, shape index: {2}]  }
   0x1   :  { %3415 = sst [smem:[#allocation10_spill]] %s3385_s0 }
   0x2   :  { %3416 = sst [smem:[#allocation11_spill]] %s3386_s1 }
   0x3   :  { %3417 = sst [smem:[#allocation12_spill]] %s3387_s2 }
   0x4   :  { %3418 = sst [smem:[#allocation13_spill]] %s3388_s3 }
   0x5   :  { %3419 = sst [smem:[#allocation14_spill]] %s3389_s4 }
   0x6   :  { %3420 = sst [smem:[#allocation15_spill]] %s3390_s5 }
   0x7   :  { %3421 = sst [smem:[#allocation16_spill]] %s3391_s6 }
   0x8   :  { %3422 = sst [smem:[#allocation17_spill]] %s3392_s7 }
   0x9   :  { %21 = vsyncpa [#allocation3], 0 }
   0xa   :  { %23 = vsyncpa [#allocation3 + $0x1], 0 }
   0xb   :  { %24 = vsyncpa [#allocation5], 0 }
   0xc   :  { %26 = vsyncpa [#allocation5 + $0x1], 0  ;;  %s2870_s18 = smov 0   ;;  %s2872_s19 = smov 0  }
   0xd   :  { %s2874_s20 = smov 0   ;;  %s2876_s21 = smov 0  }
   0xe LB: > { %s2891_s22 = sadd.s32 4294967295, %s2774_s21   ;;  %s3401_s23 = sadd.s32 4294967294, %s2774_s21   ;;  %s2774_s21 = sphi %s2876_s21, %s3447_s21   ;;  %s2770_s20 = sphi %s2874_s20, %s3446_s20   ;;  %s2766_s19 = sphi %s2872_s19, %s3445_s19   ;;  %s2762_s18 = sphi %s2870_s18, %s3444_s18  }
   0xf   : > { %s2895_s24 = sadd.s32 1, %s2774_s21   ;;  %s332_s25 = sadd.s32 1, %s2770_s20 }
  0x10   : > { %s329_s26 = ssub.s32 %s2774_s21, %s2895_s24  ;;  %p342_p0 = scmp.ne.s32.totalorder %s2770_s20, %s2766_s19 }
  0x11   : > { %p330_p1 = scmp.eq.s32.totalorder %s329_s26, 0  ;;  %p343_p2 = scmp.eq.s32.totalorder %s2891_s22, 1 }
  0x12   : > { %p348_p3 = scmp.ne.s32.totalorder %s2766_s19, %s2762_s18  ;;  %p349_p4 = scmp.eq.s32.totalorder %s3401_s23, 1 }
  0x13   : > { %s2908_s27 = scalar_select %p330_p1, %s2770_s20, %s332_s25  }
  0x14   : > { %p2910_p5 = por %p343_p2, %p342_p0  ;;  %p2914_p6 = por %p349_p4, %p348_p3 }
  0x15   : > { %3423 = sst [smem:[#allocation9_spill]] %s2908_s27  ;;  %p2267_p7 = scmp.ge.s32.totalorder %s2774_s21, 1 }
  0x16   : > { %p474_p8 = scmp.lt.s32.totalorder %s2774_s21, 3 }
  0x18   : > { %p475_p9 = pnand %p2267_p7, %p474_p8 }
  0x19   : > { %s3426_s4 = sld [smem:[#allocation14_spill]] (!%p475_p9)  ;;  %v2776_v1 = vmov (!%p475_p9), 0.0   ;;  %vm2777_vm0 = vmmov (!%p475_p9), 0   ;;  %p543_p10 = scmp.lt.s32.totalorder (!%p475_p9), %s2891_s22, 1  ;;  %vm580_vm1 = vcmask (!%p475_p9), 261120   ;;  %vm662_vm2 = vcmask (!%p475_p9), 64512  }
  0x1a   : > { %478 = sbr.rel (%p475_p9) target bundleno = 4378 (0x111a), region = 72  ;;  %2382 = vmatprep.subr.bf16.mxu1 (!%p475_p9), %v2776_v1  ;;  %2396 = vmatprep.subr.bf16.mxu0 (!%p475_p9), %v2776_v1  ;;  %s3427_s0 = sld [smem:[#allocation10_spill]] (!%p475_p9)  ;;  %vm909_vm3 = vcmask (!%p475_p9), 1043456   ;;  %vm1110_vm4 = vcmask (!%p475_p9), 130048   ;;  %vm1112_vm5 = vcmask (!%p475_p9), 195584   ;;  %vm1983_vm6 = vcmask (!%p475_p9), 523264  }
  0x1b   : > { %2386 = vmatprep.mubr.msk.bf16.mxu1 (!%p475_p9), %vm2777_vm0, %v2776_v1  ;;  %2398 = vmatprep.mubr.msk.bf16.mxu0 (!%p475_p9), %vm2777_vm0, %v2776_v1  ;;  %s3404_s25 = smov (!%p475_p9), 104   ;;  %s3406_s23 = smov (!%p475_p9), 112  }
  0x1c   : > { %s3402_s16 = smov (!%p475_p9), 96   ;;  %s3428_s2 = sld [smem:[#allocation12_spill]] (!%p475_p9) }
  0x1d   : > { %s3429_s5 = sld [smem:[#allocation15_spill]] (!%p475_p9)  ;;  %s3430_s7 = sld [smem:[#allocation17_spill]] (!%p475_p9) }
  0x1e   : > { %s3431_s1 = sld [smem:[#allocation11_spill]] (!%p475_p9)  ;;  %s3432_s6 = sld [smem:[#allocation16_spill]] (!%p475_p9) }
  0x1f   : > { %v2598_v0 = vld [vmem:[%s3426_s4] sm:$0xff] (!%p475_p9)   ;;  %v2599_v2 = vld [vmem:[%s3426_s4 + $0x8] sm:$0xff] (!%p475_p9)   ;;  %s3434_s27 = smov (!%p475_p9), 112   ;;  %s3436_s3 = sld [smem:[#allocation13_spill]] (!%p475_p9) }
  0x20   : > { %2383 = vmatpush3.bf16.msra.mxu1 (!%p475_p9), %v2598_v0 }
  0x21   : > { %2384 = vmatprep.subr.bf16.mxu1 %v2776_v1  ;;  %s544_s26 = scalar_select %p543_p10, %s2891_s22, 1 }
  0x23   : > { %s2935_s30 = sshll.u32 %s544_s26, 2  ;;  %s3409_s26 = smov 120  }
  0x24   : > { %2385 = vmatpush3.bf16.msra.mxu1 %v2599_v2  ;;  %s546_s17 = scalar_lea.vmem %s3427_s0, %s2935_s30  ;;  %s3411_s0 = smov 24  }
  0x25   : > { %2390 = vmatprep.subr.bf16.mxu1 %v2776_v1  ;;  %v2942_v3 = vld [vmem:[%s546_s17] sm:$0xf] }
  0x27   : > { %2387 = vmatmul.mubr.msk.bf16.vlgmr.msra.gmra.mrb[0].mxu1 %vm580_vm1, %v2942_v3 }
  0x28   : > { %2392 = vmatprep.mubr.msk.bf16.mxu1 %vm2777_vm0, %v2776_v1 }
  0xfa   : > { %v618_v4 = vpop.f32.mrb[0].mxu1 }
  0xfb   : > { %651 = vrot.lane.b32.xlu1 %v618_v4, %s3404_s25  ;;  %645 = vrot.lane.b32.xlu0 %v618_v4, %s3409_s26  ;;  %v2388_v5 = vpop.f32.mrb[1].mxu1  ;;  %v2950_v8 = vpack.c.bf16 %v618_v4, %v618_v4  ;;  %v629_v9 = vmul.f32 0.35355338, %v618_v4 }
  0xfc   : > { %v621_v6 = vpop.f32.mrb[2].mxu1 }
  0xfd   : > { %v2389_v7 = vpop.f32.mrb[3].mxu1  ;;  %v640_v18 = vpack.c.bf16 %v629_v9, %v629_v9 }
  0xff   : > { %648 = vrot.lane.b32.xlu0 %v618_v4, %s3406_s23  ;;  %660 = vrot.lane.b32.xlu1 %v2950_v8, %s3402_s16 }
 0x103   : > { %631 = vrot.lane.b32.xlu1 %v629_v9, %s3409_s26 }
 0x16d   : > { %v652_v10 = vpop.permute.xlu1 %651  ;;  %v646_v11 = vpop.permute.xlu0 %645 }
 0x16e   : > { %v2956_v12 = vpack.c.bf16 %v652_v10, %v652_v10  ;;  %v2958_v13 = vpack.c.bf16 %v646_v11, %v646_v11 }
 0x170   : > { %710 = vrot.lane.b32.xlu0 %v2958_v13, %s3402_s16  ;;  %808 = vrot.lane.b32.xlu1 %v2956_v12, %s3402_s16 }
 0x171   : > { %v649_v14 = vpop.permute.xlu0 %648  ;;  %v661_v15 = vpop.permute.xlu1 %660 }
 0x172   : > { %v2964_v16 = vpack.c.bf16 %v649_v14, %v649_v14  ;;  %v667_v17 = vsel %vm662_vm2, %v661_v15, 0 }
 0x173   : > { %2391 = vmatpush3.bf16.xpose.msra.mxu1 %v667_v17 }
 0x174   : > { %759 = vrot.lane.b32.xlu0 %v2964_v16, %s3402_s16  ;;  %637 = vrot.lane.b32.xlu1 %v629_v9, %s3404_s25  ;;  %s554_s25 = scalar_lea.vmem %s3428_s2, %s2935_s30  ;;  %s3013_s16 = sand.u32 1, %s2766_s19  }
 0x175   : > { %2402 = vmatprep.subr.bf16.mxu1 %v2776_v1  ;;  %v632_v21 = vpop.permute.xlu1 %631  ;;  %v624_v31 = vld [vmem:[%s554_s25] sm:$0xf]  ;;  %s2782_s25 = smov 64   ;;  %s3408_s17 = sshll.u32 %s3013_s16, 5 }
 0x176   : > { %v641_v25 = vpack.c.bf16 %v632_v21, %v632_v21  ;;  %v658_v32 = vunpack.c.l.bf16 %v624_v31  ;;  %s3413_s2 = smov 8  }
 0x178   : > { %634 = vrot.lane.b32.xlu0 %v629_v9, %s3406_s23  ;;  %s3018_s23 = scalar_lea.vmem [#allocation4], %s3408_s17  ;;  %s3412_s17 = smov 16  }
 0x17a   : > { %2393 = vmatmul.mubr.msk.bf16.vlgmr.msra.gmra.mrb[4].mxu1 %vm662_vm2, %v640_v18 }
 0x17b   : > { %2404 = vmatprep.mubr.msk.bf16.mxu1 %vm2777_vm0, %v2776_v1 }
 0x1e2   : > { %v711_v19 = vpop.permute.xlu0 %710  ;;  %v809_v24 = vpop.permute.xlu1 %808 }
 0x1e3   : > { %v716_v20 = vsel %vm662_vm2, %v711_v19, 0  ;;  %v814_v27 = vsel %vm662_vm2, %v809_v24, 0 }
 0x1e4   : > { %2397 = vmatpush3.bf16.xpose.msra.mxu0 %v716_v20 }
 0x1e5   : > { %2408 = vmatprep.subr.bf16.mxu0 %v2776_v1 }
 0x1e6   : > { %v760_v22 = vpop.permute.xlu0 %759  ;;  %v638_v29 = vpop.permute.xlu1 %637 }
 0x1e7   : > { %v765_v23 = vsel %vm662_vm2, %v760_v22, 0  ;;  %v643_v30 = vpack.c.bf16 %v638_v29, %v638_v29 }
 0x1e8   : > { %2403 = vmatpush3.bf16.xpose.msra.mxu1 %v765_v23 }
 0x1e9   : > { %2414 = vmatprep.subr.bf16.mxu1 %v2776_v1 }
 0x1ea   : > { %v635_v26 = vpop.permute.xlu0 %634 }
 0x1eb   : > { %2399 = vmatmul.mubr.msk.bf16.vlgmr.msra.gmra.mrb[0].mxu0 %vm662_vm2, %v641_v25  ;;  %v642_v28 = vpack.c.bf16 %v635_v26, %v635_v26 }
 0x1ec   : > { %2409 = vmatpush3.bf16.xpose.msra.mxu0 %v814_v27  ;;  %2410 = vmatprep.mubr.msk.bf16.mxu0 %vm2777_vm0, %v2776_v1 }
 0x1ed   : > { %2420 = vmatprep.subr.bf16.mxu0 %v2776_v1 }
 0x1ef   : > { %2405 = vmatmul.mubr.msk.bf16.vlgmr.msra.gmra.mrb[8].mxu1 %vm662_vm2, %v642_v28 }
 0x1f0   : > { %2416 = vmatprep.mubr.msk.bf16.mxu1 %vm2777_vm0, %v2776_v1 }
 0x1f3   : > { %2411 = vmatmul.mubr.msk.bf16.vlgmr.msra.gmra.mrb[4].mxu0 %vm662_vm2, %v643_v30 }
 0x1f4   : > { %2422 = vmatprep.mubr.msk.bf16.mxu0 %vm2777_vm0, %v2776_v1 }
 0x24d   : > { %v703_v33 = vpop.f32.mrb[4].mxu1 }
 0x24e   : > { %v704_v34 = vadd.f32 %v703_v33, %v658_v32  ;;  %v2394_v35 = vpop.f32.mrb[5].mxu1 }
 0x24f   : > { %v706_v36 = vpop.f32.mrb[6].mxu1 }
 0x250   : > { %v2395_v37 = vpop.f32.mrb[7].mxu1  ;;  %v856_v38 = vsel %vm662_vm2, %v704_v34, -inf }
 0x251   : > { %857 = vmax.xlane.f32.xlu0 %v856_v38 }
 0x2be   : > { %v752_v39 = vpop.f32.mrb[0].mxu0 }
 0x2bf   : > { %v753_v40 = vadd.f32 %v752_v39, %v658_v32  ;;  %v2400_v41 = vpop.f32.mrb[1].mxu0 }
 0x2c0   : > { %v755_v42 = vpop.f32.mrb[2].mxu0 }
 0x2c1   : > { %v2401_v43 = vpop.f32.mrb[3].mxu0  ;;  %v859_v44 = vsel %vm662_vm2, %v753_v40, -inf }
 0x2c2   : > { %860 = vmax.xlane.f32.xlu1 %v859_v44  ;;  %v801_v45 = vpop.f32.mrb[8].mxu1  ;;  %v2600_v43 = vld [vmem:[%s3429_s5] sm:$0xff]   ;;  %v2601_v44 = vld [vmem:[%s3429_s5 + $0x8] sm:$0xff]   ;;  %s550_s5 = scalar_lea.vmem %s3431_s1, %s2935_s30 }
 0x2c3   : > { %v802_v46 = vadd.f32 %v801_v45, %v658_v32  ;;  %v2406_v47 = vpop.f32.mrb[9].mxu1 }
 0x2c4   : > { %v804_v48 = vpop.f32.mrb[10].mxu1 }
 0x2c5   : > { %v2407_v49 = vpop.f32.mrb[11].mxu1  ;;  %v862_v50 = vsel %vm662_vm2, %v802_v46, -inf }
 0x2c6   : > { %v850_v51 = vpop.f32.mrb[4].mxu0  ;;  %863 = vmax.xlane.f32.xlu0 %v862_v50 }
 0x2c7   : > { %v851_v52 = vadd.f32 %v850_v51, %v658_v32  ;;  %v2412_v53 = vpop.f32.mrb[5].mxu0 }
 0x2c8   : > { %v853_v54 = vpop.f32.mrb[6].mxu0 }
 0x2c9   : > { %v2413_v55 = vpop.f32.mrb[7].mxu0  ;;  %v865_v56 = vsel %vm662_vm2, %v851_v52, -inf }
 0x2ca   : > { %866 = vmax.xlane.f32.xlu0 %v865_v56 }
 0x2d3   : > { %904 = vrot.lane.b32.xlu1 %v2950_v8, %s2782_s25 }
 0x2de   : > { %v858_v57 = vpop.xlane.xlu0 %857 }
 0x2df   : > { %v868_v58 = vsub.f32 %v704_v34, %v858_v57 }
 0x2e1   : > { %v872_v59 = vmul.f32 1.442695, %v868_v58 }
 0x2e3   : > { %2614 = vpow2.f32 %v872_v59 }
 0x2ed   : > { %v2615_v60 = vpop.eup %2614 }
 0x2ee   : > { %v880_v61 = vsel %vm662_vm2, %v2615_v60, 0.0 }
 0x2f7   : > { %881 = vadd.xlane.f32.xlu1 %v880_v61 }
 0x34f   : > { %v861_v62 = vpop.xlane.xlu1 %860 }
 0x350   : > { %v869_v63 = vsub.f32 %v753_v40, %v861_v62 }
 0x352   : > { %v874_v0 = vmul.f32 1.442695, %v869_v63 }
 0x353   : > { %v905_v2 = vpop.permute.xlu1 %904  ;;  %v864_v4 = vpop.xlane.xlu0 %863 }
 0x354   : > { %2616 = vpow2.f32 %v874_v0  ;;  %v911_v5 = vsel %vm909_vm3, %v905_v2, 0  ;;  %v870_v6 = vsub.f32 %v802_v46, %v864_v4  ;;  %v562_v0 = vunpack.c.l.bf16 %v2942_v3  ;;  %v2602_v3 = vld [vmem:[%s3430_s7] sm:$0xff]  }
 0x355   : > { %2415 = vmatpush3.bf16.msra.mxu1 %v911_v5 }
 0x356   : > { %v876_v7 = vmul.f32 1.442695, %v870_v6  ;;  %2426 = vmatprep.subr.bf16.mxu1 %v2776_v1 }
 0x357   : > { %v867_v8 = vpop.xlane.xlu0 %866 }
 0x358   : > { %2618 = vpow2.f32 %v876_v7  ;;  %v871_v9 = vsub.f32 %v851_v52, %v867_v8 }
 0x35a   : > { %v878_v10 = vmul.f32 1.442695, %v871_v9 }
 0x35c   : > { %2620 = vpow2.f32 %v878_v10 }
 0x35e   : > { %v2617_v11 = vpop.eup %2616 }
 0x35f   : > { %v883_v14 = vsel %vm662_vm2, %v2617_v11, 0.0 }
 0x360   : > { %884 = vadd.xlane.f32.xlu0 %v883_v14 }
 0x362   : > { %v2619_v15 = vpop.eup %2618 }
 0x363   : > { %v886_v17 = vsel %vm662_vm2, %v2619_v15, 0.0 }
 0x364   : > { %887 = vadd.xlane.f32.xlu1 %v886_v17  ;;  %v2603_v17 = vld [vmem:[%s3430_s7 + $0x8] sm:$0xff]  }
 0x366   : > { %v2621_v18 = vpop.eup %2620 }
 0x367   : > { %v889_v19 = vsel %vm662_vm2, %v2621_v18, 0.0 }
 0x368   : > { %890 = vadd.xlane.f32.xlu0 %v889_v19  ;;  %v2604_v19 = vld [vmem:[%s3432_s6] sm:$0xff]  }
 0x375   : > { %1001 = vrot.lane.b32.xlu1 %v2964_v16, %s2782_s25 }
 0x379   : > { %1049 = vrot.lane.b32.xlu1 %v2956_v12, %s2782_s25 }
 0x37e   : > { %953 = vrot.lane.b32.xlu0 %v2958_v13, %s2782_s25  ;;  %s3435_s25 = smov 104  }
 0x384   : > { %v882_v20 = vpop.xlane.xlu1 %881 }
 0x385   : > { %2622 = vrcp.f32 %v882_v20  ;;  %v2605_v20 = vld [vmem:[%s3432_s6 + $0x8] sm:$0xff]  }
 0x38f   : > { %v2623_v21 = vpop.eup %2622 }
 0x390   : > { %v893_v22 = vmul.f32 %v2623_v21, %v2615_v60 }
 0x392   : > { %1194 = vst.msk [vmem:[%s3018_s23] sm:$0xff] %vm662_vm2, %v893_v22  ;;  %v900_v16 = vpack.c.bf16 %v893_v22, %v893_v22 }
 0x394   : > { %2417 = vmatmul.mubr.msk.bf16.vlgmr.msra.gmra.mrb[12].mxu1 %vm662_vm2, %v900_v16  ;;  %v1184_v16 = vlaneseq }
 0x395   : > { %2428 = vmatprep.mubr.msk.bf16.mxu1 %vm2777_vm0, %v2776_v1 }
 0x3ed   : > { %v885_v12 = vpop.xlane.xlu0 %884 }
 0x3ee   : > { %2624 = vrcp.f32 %v885_v12 }
 0x3f1   : > { %v888_v13 = vpop.xlane.xlu1 %887 }
 0x3f2   : > { %2626 = vrcp.f32 %v888_v13  ;;  %v3089_v13 = vshrl.u32 %v1184_v16, 7 }
 0x3f5   : > { %v1002_v23 = vpop.permute.xlu1 %1001  ;;  %v891_v24 = vpop.xlane.xlu0 %890 }
 0x3f6   : > { %v1007_v25 = vsel %vm909_vm3, %v1002_v23, 0  ;;  %2628 = vrcp.f32 %v891_v24  ;;  %v1186_v23 = vsub.s32 0, %v3089_v13  ;;  %v3095_v24 = vld [vmem:[%s3397_s12] sm:$0x7f] }
 0x3f7   : > { %2427 = vmatpush3.bf16.msra.mxu1 %v1007_v25  ;;  %v1191_v25 = vsub.s32 1, %v3089_v13 }
 0x3f8   : > { %v2625_v26 = vpop.eup %2624  ;;  %2438 = vmatprep.subr.bf16.mxu1 %v2776_v1 }
 0x3f9   : > { %v895_v27 = vmul.f32 %v2625_v26, %v2617_v11  ;;  %v954_v28 = vpop.permute.xlu0 %953  ;;  %v1050_v30 = vpop.permute.xlu1 %1049  ;;  %v1187_v26 = vrot.slane %v3095_v24, %v1186_v23 }
 0x3fa   : > { %v959_v29 = vsel %vm909_vm3, %v954_v28, 0  ;;  %v1055_v34 = vsel %vm909_vm3, %v1050_v30, 0 }
 0x3fb   : > { %1195 = vst.msk [vmem:[%s3018_s23 + $0x8] sm:$0xff] %vm662_vm2, %v895_v27  ;;  %2421 = vmatpush3.bf16.msra.mxu0 %v959_v29  ;;  %v901_v31 = vpack.c.bf16 %v895_v27, %v895_v27  ;;  %v1192_v29 = vrot.slane %v3095_v24, %v1191_v25 }
 0x3fc   : > { %v2627_v32 = vpop.eup %2626  ;;  %2432 = vmatprep.subr.bf16.mxu0 %v2776_v1 }
 0x3fd   : > { %v897_v33 = vmul.f32 %v2627_v32, %v2619_v15 }
 0x3fe   : > { %2423 = vmatmul.mubr.msk.bf16.vlgmr.msra.gmra.mrb[8].mxu0 %vm662_vm2, %v901_v31 }
 0x3ff   : > { %1196 = vst.msk [vmem:[%s3018_s23 + $0x10] sm:$0xff] %vm662_vm2, %v897_v33  ;;  %2433 = vmatpush3.bf16.msra.mxu0 %v1055_v34  ;;  %v902_v35 = vpack.c.bf16 %v897_v33, %v897_v33  ;;  %2434 = vmatprep.mubr.msk.bf16.mxu0 %vm2777_vm0, %v2776_v1 }
 0x400   : > { %v2629_v36 = vpop.eup %2628  ;;  %2446 = vmatprep.subr.bf16.mxu0 %v2776_v1 }
 0x401   : > { %v899_v37 = vmul.f32 %v2629_v36, %v2621_v18  ;;  %2429 = vmatmul.mubr.msk.bf16.vlgmr.msra.gmra.mrb[16].mxu1 %vm662_vm2, %v902_v35  ;;  %v561_v18 = vld [vmem:[%s550_s5] sm:$0xf]  ;;  %s3433_s5 = smov 120  }
 0x402   : > { %2442 = vmatprep.mubr.msk.bf16.mxu1 %vm2777_vm0, %v2776_v1  ;;  %2439 = vmatpush3.bf16.msra.mxu1 %v2600_v43 }
 0x403   : > { %1197 = vst.msk [vmem:[%s3018_s23 + $0x18] sm:$0xff] %vm662_vm2, %v899_v37  ;;  %v903_v38 = vpack.c.bf16 %v899_v37, %v899_v37  ;;  %2440 = vmatprep.subr.bf16.mxu1 %v2776_v1 }
 0x406   : > { %2435 = vmatmul.mubr.msk.bf16.vlgmr.msra.gmra.mrb[12].mxu0 %vm662_vm2, %v903_v38  ;;  %2441 = vmatpush3.bf16.msra.mxu1 %v2601_v44 }
 0x407   : > { %2450 = vmatprep.mubr.msk.bf16.mxu0 %vm2777_vm0, %v2776_v1  ;;  %2454 = vmatprep.subr.bf16.mxu1 %v2776_v1 }
 0x408   : > { %2447 = vmatpush3.bf16.msra.mxu0 %v2604_v19 }
 0x409   : > { %2448 = vmatprep.subr.bf16.mxu0 %v2776_v1 }
 0x40c   : > { %2449 = vmatpush3.bf16.msra.mxu0 %v2605_v20 }
 0x40d   : > { %2462 = vmatprep.subr.bf16.mxu0 %v2776_v1 }
 0x467   : > { %v947_v39 = vpop.f32.mrb[12].mxu1 }
 0x468   : > { %v2418_v40 = vpop.f32.mrb[13].mxu1 }
 0x469   : > { %v950_v41 = vpop.f32.mrb[14].mxu1 }
 0x46a   : > { %v2419_v42 = vpop.f32.mrb[15].mxu1 }
 0x4d1   : > { %v995_v45 = vpop.f32.mrb[8].mxu0 }
 0x4d2   : > { %1098 = vrot.lane.b32.xlu0 %v995_v45, %s3413_s2  ;;  %v2424_v46 = vpop.f32.mrb[9].mxu0  ;;  %s3438_s2 = sshll.u32 %s3013_s16, 5 }
 0x4d3   : > { %v998_v47 = vpop.f32.mrb[10].mxu0  ;;  %s3171_s4 = scalar_lea.vmem [#allocation6], %s3438_s2 }
 0x4d4   : > { %v2425_v48 = vpop.f32.mrb[11].mxu0  ;;  %v1043_v49 = vpop.f32.mrb[16].mxu1 }
 0x4d5   : > { %1102 = vrot.lane.b32.xlu1 %v1043_v49, %s3412_s17  ;;  %v2430_v50 = vpop.f32.mrb[17].mxu1  ;;  %s3439_s17 = smov 8  }
 0x4d6   : > { %v1046_v51 = vpop.f32.mrb[18].mxu1 }
 0x4d7   : > { %v2431_v52 = vpop.f32.mrb[19].mxu1 }
 0x4d9   : > { %v1091_v53 = vpop.f32.mrb[12].mxu0 }
 0x4da   : > { %1106 = vrot.lane.b32.xlu0 %v1091_v53, %s3411_s0  ;;  %v2436_v54 = vpop.f32.mrb[13].mxu0  ;;  %s558_s0 = scalar_lea.vmem %s3436_s3, %s2935_s30  ;;  %s3437_s30 = smov 96  }
 0x4db   : > { %v1094_v55 = vpop.f32.mrb[14].mxu0  ;;  %s2786_s3 = smov [#allocation4]  }
 0x4dc   : > { %v2437_v56 = vpop.f32.mrb[15].mxu0  ;;  %s2656_s6 = sshll.u32 %s2786_s3, 4  ;;  %s2657_s6 = int_to_ptr.vmem [resolvable:$false] %s2656_s6 }
 0x4dd   : > { %s2658_s7 = scalar_lea.vmem %s2657_s6, 1024 }
 0x544   : > { %v1099_v57 = vpop.permute.xlu0 %1098 }
 0x545   : > { %v1109_v59 = vsel %vm662_vm2, %v947_v39, %v1099_v57 }
 0x547   : > { %v1103_v58 = vpop.permute.xlu1 %1102 }
 0x548   : > { %v1111_v60 = vsel %vm1110_vm4, %v1109_v59, %v1103_v58 }
 0x54c   : > { %v1107_v61 = vpop.permute.xlu0 %1106 }
 0x54d   : > { %v1113_v62 = vsel %vm1112_vm5, %v1111_v60, %v1107_v61  ;;  %v1317_v60 = vld [vmem:[%s558_s0] sm:$0xf]  ;;  %s3440_s0 = smov 16  }
 0x54e   : > { %v1114_v63 = vpack.c.bf16 %v1113_v62, %v1113_v62  ;;  %v1351_v61 = vunpack.c.l.bf16 %v1317_v60 }
 0x550   : > { %2443 = vmatmul.mubr.msk.bf16.vlgmr.msra.gmra.mrb[20].mxu1 %vm580_vm1, %v1114_v63 }
 0x551   : > { %2458 = vmatprep.mubr.msk.bf16.mxu1 %vm2777_vm0, %v2776_v1  ;;  %2455 = vmatpush3.bf16.msra.mxu1 %v2602_v3 }
 0x552   : > { %2456 = vmatprep.subr.bf16.mxu1 %v2776_v1 }
 0x555   : > { %2457 = vmatpush3.bf16.msra.mxu1 %v2603_v17 }
 0x556   : > { %2468 = vmatprep.subr.bf16.mxu1 %v2776_v1 }
 0x558   : > { %2459 = vmatmul.mubr.msk.bf16.vlgmr.msra.gmra.mrb[24].mxu1 %vm580_vm1, %v561_v18 }
 0x559   : > { %2470 = vmatprep.mubr.msk.bf16.mxu1 %vm2777_vm0, %v2776_v1 }
 0x623   : > { %v1164_v2 = vpop.f32.mrb[20].mxu1 }
 0x624   : > { %v1165_v4 = vadd.f32 %v1164_v2, %v562_v0  ;;  %v2444_v5 = vpop.f32.mrb[21].mxu1 }
 0x625   : > { %v1167_v6 = vpop.f32.mrb[22].mxu1 }
 0x626   : > { %v2445_v7 = vpop.f32.mrb[23].mxu1  ;;  %v1170_v8 = vsel %vm580_vm1, %v1165_v4, 0.0 }
 0x627   : > { %1171 = vadd.xlane.f32.xlu1 %v1170_v8 }
 0x62b   : > { %v1311_v33 = vpop.f32.mrb[24].mxu1 }
 0x62c   : > { %v2460_v34 = vpop.f32.mrb[25].mxu1  ;;  %v3108_v35 = vpack.c.bf16 %v1311_v33, %v1311_v33 }
 0x62d   : > { %v1314_v36 = vpop.f32.mrb[26].mxu1 }
 0x62e   : > { %v2461_v37 = vpop.f32.mrb[27].mxu1  ;;  %v1356_v38 = vsel %vm662_vm2, %v3108_v35, 0 }
 0x638   : > { %1341 = vrot.lane.b32.xlu1 %v1311_v33, %s3434_s27 }
 0x6b4   : > { %v1172_v9 = vpop.xlane.xlu1 %1171 }
 0x6b5   : > { %v1174_v10 = vmul.f32 0.03125, %v1172_v9 }
 0x6b7   : > { %v1175_v11 = vsub.f32 %v1165_v4, %v1174_v10 }
 0x6b8   : > { %v1342_v42 = vpop.permute.xlu1 %1341 }
 0x6b9   : > { %v1176_v14 = vmul.f32 %v1175_v11, %v1175_v11  ;;  %v3120_v43 = vpack.c.bf16 %v1342_v42, %v1342_v42 }
 0x6bb   : > { %v1177_v15 = vsel %vm580_vm1, %v1176_v14, 0.0  ;;  %v1448_v50 = vsel %vm662_vm2, %v3120_v43, 0 }
 0x6bc   : > { %1178 = vadd.xlane.f32.xlu0 %v1177_v15 }
 0x6d2   : > { %1338 = vrot.lane.b32.xlu0 %v1311_v33, %s3433_s5 }
 0x6d6   : > { %1344 = vrot.lane.b32.xlu0 %v1311_v33, %s3435_s25 }
 0x749   : > { %v1179_v21 = vpop.xlane.xlu0 %1178 }
 0x74a   : > { %v1180_v22 = vmul.f32 0.03125, %v1179_v21 }
 0x74c   : > { %v1181_v12 = vadd.f32 1e-06, %v1180_v22 }
 0x74d   : > { %v1339_v39 = vpop.permute.xlu0 %1338 }
 0x74e   : > { %2630 = vrsqrt.f32 %v1181_v12  ;;  %v3115_v40 = vpack.c.bf16 %v1339_v39, %v1339_v39 }
 0x750   : > { %v1402_v41 = vsel %vm662_vm2, %v3115_v40, 0 }
 0x751   : > { %2469 = vmatpush3.bf16.xpose.msra.mxu1 %v1402_v41  ;;  %v1345_v51 = vpop.permute.xlu0 %1344 }
 0x752   : > { %2480 = vmatprep.subr.bf16.mxu1 %v2776_v1  ;;  %v3131_v52 = vpack.c.bf16 %v1345_v51, %v1345_v51 }
 0x754   : > { %v1494_v55 = vsel %vm662_vm2, %v3131_v52, 0 }
 0x758   : > { %v2631_v27 = vpop.eup %2630 }
 0x759   : > { %v1183_v28 = vmul.f32 %v2631_v27, %v1175_v11 }
 0x75b   : > { %v1188_v30 = vmul.f32 %v1187_v26, %v1183_v28 }
 0x75d   : > { %v3100_v31 = vadd.f32 %v1192_v29, %v1188_v30 }
 0x75f   : > { %v1198_v32 = vpack.c.bf16 %v3100_v31, %v3100_v31 }
 0x761   : > { %2451 = vmatmul.mubr.msk.bf16.vlgmr.msra.gmra.mrb[16].mxu0 %vm580_vm1, %v1198_v32 }
 0x762   : > { %2464 = vmatprep.mubr.msk.bf16.mxu0 %vm2777_vm0, %v2776_v1  ;;  %2463 = vmatpush3.bf16.xpose.msra.mxu0 %v1356_v38 }
 0x763   : > { %2474 = vmatprep.subr.bf16.mxu0 %v2776_v1 }
 0x834   : > { %v1252_v44 = vpop.f32.mrb[16].mxu0 }
 0x835   : > { %v1322_v45 = vmul.f32 0.35355338, %v1252_v44  ;;  %v2452_v46 = vpop.f32.mrb[17].mxu0 }
 0x836   : > { %v1255_v47 = vpop.f32.mrb[18].mxu0 }
 0x837   : > { %v1333_v48 = vpack.c.bf16 %v1322_v45, %v1322_v45  ;;  %1330 = vrot.lane.b32.xlu0 %v1322_v45, %s3435_s25  ;;  %1324 = vrot.lane.b32.xlu1 %v1322_v45, %s3433_s5  ;;  %v2453_v49 = vpop.f32.mrb[19].mxu0 }
 0x839   : > { %2465 = vmatmul.mubr.msk.bf16.vlgmr.msra.gmra.mrb[20].mxu0 %vm662_vm2, %v1333_v48 }
 0x83a   : > { %2475 = vmatpush3.bf16.xpose.msra.mxu0 %v1448_v50  ;;  %2476 = vmatprep.mubr.msk.bf16.mxu0 %vm2777_vm0, %v2776_v1 }
 0x83b   : > { %1327 = vrot.lane.b32.xlu1 %v1322_v45, %s3434_s27  ;;  %2486 = vmatprep.subr.bf16.mxu0 %v2776_v1  ;;  %s2089_s27 = sshll.u32 %s3018_s23, 4  ;;  %s3265_s27 = int_to_ptr.vmem [resolvable:$true] %s2089_s27 }
 0x83c   : > { %s2652_s26 = scalar_lea.vmem %s3265_s27, 512  ;;  %p2659_p0 = scmp.lt.s32.totalorder %s3265_s27, %s2657_s6 }
 0x83d   : > { %p2653_p11 = scmp.ne.s32.totalorder %s3265_s27, %s2652_s26  ;;  %p2660_p1 = scmp.lt.s32.totalorder %s2658_s7, %s2652_s26 }
 0x83f   : > { %p2654_p12 = pnand %p2653_p11, %p2910_p5  ;;  %p2661_p2 = por %p2660_p1, %p2659_p0 }
 0x841   : > { %p2655_p13 = pneg %p2654_p12 }
 0x843   : > { %p2662_p3 = pnand %p2661_p2, %p2655_p13 }
 0x8a9   : > { %v1325_v53 = vpop.permute.xlu1 %1324  ;;  %v1331_v58 = vpop.permute.xlu0 %1330 }
 0x8aa   : > { %v1334_v54 = vpack.c.bf16 %v1325_v53, %v1325_v53  ;;  %v1336_v59 = vpack.c.bf16 %v1331_v58, %v1331_v58 }
 0x8ac   : > { %2471 = vmatmul.mubr.msk.bf16.vlgmr.msra.gmra.mrb[28].mxu1 %vm662_vm2, %v1334_v54 }
 0x8ad   : > { %2481 = vmatpush3.bf16.xpose.msra.mxu1 %v1494_v55  ;;  %v1328_v56 = vpop.permute.xlu1 %1327  ;;  %2482 = vmatprep.mubr.msk.bf16.mxu1 %vm2777_vm0, %v2776_v1 }
 0x8ae   : > { %v1335_v57 = vpack.c.bf16 %v1328_v56, %v1328_v56  ;;  %2492 = vmatprep.subr.bf16.mxu1 %v2776_v1 }
 0x8b0   : > { %2477 = vmatmul.mubr.msk.bf16.vlgmr.msra.gmra.mrb[24].mxu0 %vm662_vm2, %v1335_v57 }
 0x8b1   : > { %2488 = vmatprep.mubr.msk.bf16.mxu0 %vm2777_vm0, %v2776_v1 }
 0x8b4   : > { %2483 = vmatmul.mubr.msk.bf16.vlgmr.msra.gmra.mrb[32].mxu1 %vm662_vm2, %v1336_v59 }
 0x8b5   : > { %2494 = vmatprep.mubr.msk.bf16.mxu1 %vm2777_vm0, %v2776_v1 }
 0x90c   : > { %v1392_v62 = vpop.f32.mrb[20].mxu0 }
 0x90d   : > { %v1393_v63 = vadd.f32 %v1392_v62, %v1351_v61  ;;  %v2466_v0 = vpop.f32.mrb[21].mxu0 }
 0x90e   : > { %v1395_v2 = vpop.f32.mrb[22].mxu0 }
 0x90f   : > { %v2467_v4 = vpop.f32.mrb[23].mxu0  ;;  %v1536_v5 = vsel %vm662_vm2, %v1393_v63, -inf }
 0x910   : > { %1537 = vmax.xlane.f32.xlu1 %v1536_v5 }
 0x97f   : > { %v1438_v6 = vpop.f32.mrb[28].mxu1 }
 0x980   : > { %v1439_v7 = vadd.f32 %v1438_v6, %v1351_v61  ;;  %v2472_v8 = vpop.f32.mrb[29].mxu1 }
 0x981   : > { %v1441_v9 = vpop.f32.mrb[30].mxu1 }
 0x982   : > { %v2473_v10 = vpop.f32.mrb[31].mxu1  ;;  %v1539_v11 = vsel %vm662_vm2, %v1439_v7, -inf }
 0x983   : > { %1540 = vmax.xlane.f32.xlu0 %v1539_v11  ;;  %v1484_v14 = vpop.f32.mrb[24].mxu0 }
 0x984   : > { %v1485_v15 = vadd.f32 %v1484_v14, %v1351_v61  ;;  %v2478_v3 = vpop.f32.mrb[25].mxu0  ;;  %v2606_v14 = vld [vmem:[%s3393_s8] sm:$0xff]  }
 0x985   : > { %v1487_v17 = vpop.f32.mrb[26].mxu0 }
 0x986   : > { %v2479_v18 = vpop.f32.mrb[27].mxu0  ;;  %v1542_v19 = vsel %vm662_vm2, %v1485_v15, -inf }
 0x987   : > { %v1530_v20 = vpop.f32.mrb[32].mxu1  ;;  %1543 = vmax.xlane.f32.xlu0 %v1542_v19 }
 0x988   : > { %v1531_v21 = vadd.f32 %v1530_v20, %v1351_v61  ;;  %v2484_v22 = vpop.f32.mrb[33].mxu1 }
 0x989   : > { %v1533_v16 = vpop.f32.mrb[34].mxu1 }
 0x98a   : > { %v2485_v12 = vpop.f32.mrb[35].mxu1  ;;  %v1545_v23 = vsel %vm662_vm2, %v1531_v21, -inf }
 0x98b   : > { %1546 = vmax.xlane.f32.xlu1 %v1545_v23 }
 0x99c   : > { %1634 = vrot.lane.b32.xlu1 %v3115_v40, %s3437_s30 }
 0x99d   : > { %1585 = vrot.lane.b32.xlu0 %v3108_v35, %s3437_s30  ;;  %v1538_v25 = vpop.xlane.xlu1 %1537 }
 0x99e   : > { %v1548_v26 = vsub.f32 %v1393_v63, %v1538_v25 }
 0x9a0   : > { %v1552_v27 = vmul.f32 1.442695, %v1548_v26 }
 0x9a2   : > { %2632 = vpow2.f32 %v1552_v27 }
 0x9ac   : > { %v2633_v28 = vpop.eup %2632 }
 0x9ad   : > { %v1560_v29 = vsel %vm662_vm2, %v2633_v28, 0.0 }
 0x9bc   : > { %1561 = vadd.xlane.f32.xlu0 %v1560_v29 }
 0xa10   : > { %v1541_v30 = vpop.xlane.xlu0 %1540 }
 0xa11   : > { %v1549_v32 = vsub.f32 %v1439_v7, %v1541_v30 }
 0xa13   : > { %v1554_v33 = vmul.f32 1.442695, %v1549_v32 }
 0xa14   : > { %v1544_v34 = vpop.xlane.xlu0 %1543 }
 0xa15   : > { %2634 = vpow2.f32 %v1554_v33  ;;  %v1550_v36 = vsub.f32 %v1485_v15, %v1544_v34  ;;  %v2607_v15 = vld [vmem:[%s3393_s8 + $0x8] sm:$0xff]  }
 0xa17   : > { %v1556_v37 = vmul.f32 1.442695, %v1550_v36 }
 0xa18   : > { %v1586_v38 = vpop.permute.xlu0 %1585  ;;  %v1547_v39 = vpop.xlane.xlu1 %1546 }
 0xa19   : > { %2636 = vpow2.f32 %v1556_v37  ;;  %v1591_v35 = vsel %vm909_vm3, %v1586_v38, 0  ;;  %v1551_v40 = vsub.f32 %v1531_v21, %v1547_v39 }
 0xa1a   : > { %2487 = vmatpush3.bf16.msra.mxu0 %v1591_v35 }
 0xa1b   : > { %v1558_v41 = vmul.f32 1.442695, %v1551_v40  ;;  %2498 = vmatprep.subr.bf16.mxu0 %v2776_v1 }
 0xa1c   : > { %v1635_v42 = vpop.permute.xlu1 %1634 }
 0xa1d   : > { %2638 = vpow2.f32 %v1558_v41  ;;  %v1640_v44 = vsel %vm909_vm3, %v1635_v42, 0 }
 0xa1e   : > { %2493 = vmatpush3.bf16.msra.mxu1 %v1640_v44 }
 0xa1f   : > { %v2635_v45 = vpop.eup %2634  ;;  %2504 = vmatprep.subr.bf16.mxu1 %v2776_v1 }
 0xa20   : > { %v1563_v46 = vsel %vm662_vm2, %v2635_v45, 0.0 }
 0xa21   : > { %1564 = vadd.xlane.f32.xlu1 %v1563_v46 }
 0xa23   : > { %v2637_v47 = vpop.eup %2636 }
 0xa24   : > { %v1566_v48 = vsel %vm662_vm2, %v2637_v47, 0.0 }
 0xa25   : > { %1567 = vadd.xlane.f32.xlu0 %v1566_v48  ;;  %v2610_v48 = vld [vmem:[%s3396_s11] sm:$0xff]  }
 0xa27   : > { %v2639_v49 = vpop.eup %2638 }
 0xa28   : > { %v1569_v50 = vsel %vm662_vm2, %v2639_v49, 0.0 }
 0xa29   : > { %1570 = vadd.xlane.f32.xlu1 %v1569_v50 }
 0xa3a   : > { %1683 = vrot.lane.b32.xlu1 %v3120_v43, %s3437_s30 }
 0xa3b   : > { %1732 = vrot.lane.b32.xlu0 %v3131_v52, %s3437_s30  ;;  %s3441_s30 = smov 24  }
 0xa49   : > { %v1562_v51 = vpop.xlane.xlu0 %1561 }
 0xa4a   : > { %2640 = vrcp.f32 %v1562_v51 }
 0xa54   : > { %v2641_v53 = vpop.eup %2640 }
 0xa55   : > { %v1573_v54 = vmul.f32 %v2641_v53, %v2633_v28 }
 0xa57   : > { %1874 = vst.msk [vmem:[%s3171_s4] sm:$0xff] %vm662_vm2, %v1573_v54  ;;  %v1580_v55 = vpack.c.bf16 %v1573_v54, %v1573_v54  ;;  %v1866_v54 = vsub.s32 2, %v3089_v13 }
 0xa59   : > { %2489 = vmatmul.mubr.msk.bf16.vlgmr.msra.gmra.mrb[28].mxu0 %vm662_vm2, %v1580_v55  ;;  %v1871_v55 = vsub.s32 3, %v3089_v13 }
 0xa5a   : > { %2500 = vmatprep.mubr.msk.bf16.mxu0 %vm2777_vm0, %v2776_v1 }
 0xaae   : > { %v1565_v43 = vpop.xlane.xlu1 %1564 }
 0xaaf   : > { %2642 = vrcp.f32 %v1565_v43  ;;  %v1867_v43 = vrot.slane %v3095_v24, %v1866_v54 }
 0xab2   : > { %v1568_v52 = vpop.xlane.xlu0 %1567 }
 0xab3   : > { %2644 = vrcp.f32 %v1568_v52 }
 0xab6   : > { %v1571_v56 = vpop.xlane.xlu1 %1570  ;;  %v1733_v60 = vpop.permute.xlu0 %1732 }
 0xab7   : > { %2646 = vrcp.f32 %v1571_v56  ;;  %v1738_v2 = vsel %vm909_vm3, %v1733_v60, 0 }
 0xab9   : > { %v2643_v57 = vpop.eup %2642 }
 0xaba   : > { %v1575_v58 = vmul.f32 %v2643_v57, %v2635_v45  ;;  %v1684_v59 = vpop.permute.xlu1 %1683  ;;  %v1872_v57 = vrot.slane %v3095_v24, %v1871_v55 }
 0xabb   : > { %v1689_v61 = vsel %vm909_vm3, %v1684_v59, 0 }
 0xabc   : > { %1875 = vst.msk [vmem:[%s3171_s4 + $0x8] sm:$0xff] %vm662_vm2, %v1575_v58  ;;  %2499 = vmatpush3.bf16.msra.mxu0 %v1689_v61  ;;  %v1581_v62 = vpack.c.bf16 %v1575_v58, %v1575_v58  ;;  %v2612_v61 = vld [vmem:[%s3396_s11 + $0x10] sm:$0xff]  }
 0xabd   : > { %v2645_v63 = vpop.eup %2644  ;;  %2510 = vmatprep.subr.bf16.mxu0 %v2776_v1 }
 0xabe   : > { %v1577_v0 = vmul.f32 %v2645_v63, %v2637_v47  ;;  %2495 = vmatmul.mubr.msk.bf16.vlgmr.msra.gmra.mrb[36].mxu1 %vm662_vm2, %v1581_v62  ;;  %v2608_v47 = vld [vmem:[%s3394_s9] sm:$0xff]   ;;  %v2613_v62 = vld [vmem:[%s3396_s11 + $0x18] sm:$0xff]  }
 0xabf   : > { %2505 = vmatpush3.bf16.msra.mxu1 %v1738_v2  ;;  %2506 = vmatprep.mubr.msk.bf16.mxu1 %vm2777_vm0, %v2776_v1  ;;  %v2306_v63 = vld [vmem:[%s3395_s10] ss:$0 sm:$0xff] }
 0xac0   : > { %1876 = vst.msk [vmem:[%s3171_s4 + $0x10] sm:$0xff] %vm662_vm2, %v1577_v0  ;;  %v1582_v4 = vpack.c.bf16 %v1577_v0, %v1577_v0  ;;  %2518 = vmatprep.subr.bf16.mxu1 %v2776_v1 }
 0xac1   : > { %v2647_v5 = vpop.eup %2646 }
 0xac2   : > { %v1579_v6 = vmul.f32 %v2647_v5, %v2639_v49  ;;  %2501 = vmatmul.mubr.msk.bf16.vlgmr.msra.gmra.mrb[32].mxu0 %vm662_vm2, %v1582_v4  ;;  %v2611_v49 = vld [vmem:[%s3396_s11 + $0x8] sm:$0xff]  }
 0xac3   : > { %2514 = vmatprep.mubr.msk.bf16.mxu0 %vm2777_vm0, %v2776_v1  ;;  %2511 = vmatpush3.bf16.msra.mxu0 %v2606_v14 }
 0xac4   : > { %1877 = vst.msk [vmem:[%s3171_s4 + $0x18] sm:$0xff] %vm662_vm2, %v1579_v6  ;;  %v1583_v7 = vpack.c.bf16 %v1579_v6, %v1579_v6  ;;  %2512 = vmatprep.subr.bf16.mxu0 %v2776_v1 }
 0xac6   : > { %2507 = vmatmul.mubr.msk.bf16.vlgmr.msra.gmra.mrb[40].mxu1 %vm662_vm2, %v1583_v7 }
 0xac7   : > { %2522 = vmatprep.mubr.msk.bf16.mxu1 %vm2777_vm0, %v2776_v1  ;;  %2513 = vmatpush3.bf16.msra.mxu0 %v2607_v15 }
 0xac8   : > { %2526 = vmatprep.subr.bf16.mxu0 %v2776_v1  ;;  %2519 = vmatpush3.bf16.msra.mxu1 %v2608_v47 }
 0xac9   : > { %2520 = vmatprep.subr.bf16.mxu1 %v2776_v1 }
 0xb2c   : > { %v1627_v8 = vpop.f32.mrb[28].mxu0 }
 0xb2d   : > { %v2490_v9 = vpop.f32.mrb[29].mxu0 }
 0xb2e   : > { %v1630_v10 = vpop.f32.mrb[30].mxu0 }
 0xb2f   : > { %v2491_v11 = vpop.f32.mrb[31].mxu0 }
 0xb91   : > { %v1676_v3 = vpop.f32.mrb[36].mxu1 }
 0xb92   : > { %1781 = vrot.lane.b32.xlu1 %v1676_v3, %s3439_s17  ;;  %v2496_v17 = vpop.f32.mrb[37].mxu1 }
 0xb93   : > { %v1679_v18 = vpop.f32.mrb[38].mxu1 }
 0xb94   : > { %v2497_v19 = vpop.f32.mrb[39].mxu1 }
 0xb95   : > { %v1725_v20 = vpop.f32.mrb[32].mxu0 }
 0xb96   : > { %1785 = vrot.lane.b32.xlu0 %v1725_v20, %s3440_s0  ;;  %v2502_v21 = vpop.f32.mrb[33].mxu0  ;;  %s2057_s0 = sand.u32 1, %s2891_s22  }
 0xb97   : > { %v1728_v22 = vpop.f32.mrb[34].mxu0  ;;  %s3267_s25 = scalar_lea.sflag [#allocation5], %s2057_s0 }
 0xb98   : > { %v2503_v16 = vpop.f32.mrb[35].mxu0 }
 0xb99   : > { %v1774_v12 = vpop.f32.mrb[40].mxu1 }
 0xb9a   : > { %1789 = vrot.lane.b32.xlu1 %v1774_v12, %s3441_s30  ;;  %v2508_v23 = vpop.f32.mrb[41].mxu1  ;;  %s2325_s30 = sshll.u32 %s2891_s22, 9 }
 0xb9b   : > { %v1777_v25 = vpop.f32.mrb[42].mxu1  ;;  %s3262_s5 = scalar_lea.hbm %s3399_s14, %s2325_s30 }
 0xb9c   : > { %v2509_v26 = vpop.f32.mrb[43].mxu1 }
 0xc04   : > { %v1782_v27 = vpop.permute.xlu1 %1781 }
 0xc05   : > { %v1792_v29 = vsel %vm662_vm2, %v1627_v8, %v1782_v27 }
 0xc08   : > { %v1786_v28 = vpop.permute.xlu0 %1785 }
 0xc09   : > { %v1793_v30 = vsel %vm1110_vm4, %v1792_v29, %v1786_v28 }
 0xc0c   : > { %v1790_v32 = vpop.permute.xlu1 %1789 }
 0xc0d   : > { %v1794_v33 = vsel %vm1112_vm5, %v1793_v30, %v1790_v32 }
 0xc0e   : > { %v1795_v34 = vpack.c.bf16 %v1794_v33, %v1794_v33 }
 0xc10   : > { %2515 = vmatmul.mubr.msk.bf16.vlgmr.msra.gmra.mrb[36].mxu0 %vm580_vm1, %v1795_v34 }
 0xc11   : > { %2534 = vmatprep.mubr.msk.bf16.mxu0 %vm2777_vm0, %v2776_v1  ;;  %2527 = vmatpush3.bf16.msra.mxu0 %v2610_v48 }
 0xc12   : > { %2528 = vmatprep.subr.bf16.mxu0 %v2776_v1 }
 0xc15   : > { %2529 = vmatpush3.bf16.msra.mxu0 %v2611_v49 }
 0xc16   : > { %2530 = vmatprep.subr.bf16.mxu0 %v2776_v1 }
 0xc19   : > { %2531 = vmatpush3.bf16.msra.mxu0 %v2612_v61 }
 0xc1a   : > { %2532 = vmatprep.subr.bf16.mxu0 %v2776_v1  ;;  %v1957_v1 = vsub.s32 6, %v3089_v13 }
 0xc1c   : > { %v1958_v9 = vrot.slane %v3095_v24, %v1957_v1 }
 0xc1d   : > { %2533 = vmatpush3.bf16.msra.mxu0 %v2613_v62 }
 0xce3   : > { %v1845_v36 = vpop.f32.mrb[36].mxu0 }
 0xce4   : > { %v1846_v37 = vadd.f32 %v1845_v36, %v3100_v31  ;;  %v2516_v38 = vpop.f32.mrb[37].mxu0  ;;  %v2609_v31 = vld [vmem:[%s3394_s9 + $0x8] sm:$0xff]  }
 0xce5   : > { %v1848_v39 = vpop.f32.mrb[38].mxu0  ;;  %2521 = vmatpush3.bf16.msra.mxu1 %v2609_v31 }
 0xce6   : > { %v2517_v35 = vpop.f32.mrb[39].mxu0  ;;  %v1851_v40 = vsel %vm580_vm1, %v1846_v37, 0.0 }
 0xce7   : > { %1852 = vadd.xlane.f32.xlu0 %v1851_v40 }
 0xd74   : > { %v1853_v41 = vpop.xlane.xlu0 %1852 }
 0xd75   : > { %v1854_v42 = vmul.f32 0.03125, %v1853_v41 }
 0xd77   : > { %v1855_v44 = vsub.f32 %v1846_v37, %v1854_v42 }
 0xd79   : > { %v1856_v45 = vmul.f32 %v1855_v44, %v1855_v44 }
 0xd7b   : > { %v1857_v46 = vsel %vm580_vm1, %v1856_v45, 0.0 }
 0xd7c   : > { %1858 = vadd.xlane.f32.xlu1 %v1857_v46 }
 0xe09   : > { %v1859_v50 = vpop.xlane.xlu1 %1858 }
 0xe0a   : > { %v1860_v51 = vmul.f32 0.03125, %v1859_v50 }
 0xe0c   : > { %v1861_v53 = vadd.f32 1e-06, %v1860_v51 }
 0xe0e   : > { %2648 = vrsqrt.f32 %v1861_v53 }
 0xe18   : > { %v2649_v52 = vpop.eup %2648 }
 0xe19   : > { %v1863_v56 = vmul.f32 %v2649_v52, %v1855_v44 }
 0xe1b   : > { %v1868_v58 = vmul.f32 %v1867_v43, %v1863_v56 }
 0xe1d   : > { %v1873_v59 = vadd.f32 %v1872_v57, %v1868_v58 }
 0xe1f   : > { %v1878_v60 = vpack.c.bf16 %v1873_v59, %v1873_v59 }
 0xe21   : > { %2523 = vmatmul.mubr.msk.bf16.vlgmr.msra.gmra.mrb[44].mxu1 %vm580_vm1, %v1878_v60 }
 0xef4   : > { %v1939_v0 = vpop.f32.mrb[44].mxu1 }
 0xef5   : > { %v1940_v2 = vadd.f32 %v2306_v63, %v1939_v0  ;;  %v2524_v4 = vpop.f32.mrb[45].mxu1 }
 0xef6   : > { %v1942_v5 = vpop.f32.mrb[46].mxu1 }
 0xef7   : > { %v1945_v6 = vmax.f32 %v1940_v2, 0.0  ;;  %v2525_v7 = vpop.f32.mrb[47].mxu1 }
 0xef9   : > { %v1946_v8 = vpack.c.bf16 %v1945_v6, %v1945_v6 }
 0xefb   : > { %2535 = vmatmul.mubr.msk.bf16.vlgmr.msra.gmra.mrb[40].mxu0 %vm1983_vm6, %v1946_v8 }
 0xfce   : > { %v2021_v10 = vpop.f32.mrb[40].mxu0 }
 0xfcf   : > { %v2022_v11 = vadd.f32 %v2021_v10, %v1958_v9  ;;  %v2536_v14 = vpop.f32.mrb[41].mxu0 }
 0xfd0   : > { %v2024_v15 = vpop.f32.mrb[42].mxu0 }
 0xfd1   : > { %v2537_v3 = vpop.f32.mrb[43].mxu0  ;;  %v2027_v17 = vadd.f32 %v2022_v11, %v1873_v59 }
 0xfd3   : > { %v2028_v18 = vsel %vm580_vm1, %v2027_v17, 0.0 }
 0xfd4   : > { %2029 = vadd.xlane.f32.xlu0 %v2028_v18 }
0x1061   : > { %v2030_v19 = vpop.xlane.xlu0 %2029 }
0x1062   : > { %v2031_v20 = vmul.f32 0.03125, %v2030_v19 }
0x1064   : > { %v3250_v21 = vsub.f32 %v2027_v17, %v2031_v20 }
0x1066   : > { %v2033_v22 = vmul.f32 %v3250_v21, %v3250_v21 }
0x1068   : > { %v2034_v16 = vsel %vm580_vm1, %v2033_v22, 0.0 }
0x1069   : > { %2035 = vadd.xlane.f32.xlu0 %v2034_v16 }
0x106a   : > { %2665 = shalt.err (!%p2662_p3)
}
0x106b   : > { %s2666_s23 = scalar_lea.hbm %s3262_s5, 512  ;;  %s2670_s3 = scalar_lea.hbm %s3399_s14, 1024 }
0x106c   : > { %p2667_p4 = scmp.ne.s32.totalorder %s3262_s5, %s2666_s23  ;;  %p2671_p9 = scmp.lt.u32.totalorder %s3262_s5, %s3399_s14 }
0x106d   : > { %p2672_p10 = scmp.lt.u32.totalorder %s2670_s3, %s2666_s23  ;;  %p2674_p12 = scmp.lt.u32.totalorder %s2666_s23, %s3262_s5 }
0x106e   : > { %p2668_p7 = pnand %p2667_p4, %p2910_p5 }
0x106f   : > { %p2673_p11 = por %p2672_p10, %p2671_p9 }
0x1070   : > { %p2669_p8 = pneg %p2668_p7 }
0x1071   : > { %p2675_p13 = por %p2674_p12, %p2673_p11 }
0x1073   : > { %p2676_p0 = pnand %p2675_p13, %p2669_p8 }
0x1075   : > { %2679 = shalt.err (!%p2676_p0)
}
0x1076   : > { %s2787_s7 = smov 128   ;;  %s3299_s23 = scalar_lea.hbm %s3400_s15, %s2325_s30 }
0x1077   : > { %2539 = dma.vmem_to_hbm [thread:$0]  (%p2910_p5), %s3265_s27, 512, %s3262_s5, %s3267_s25, %s2787_s7, %s2787_s7, %s3439_s17  }
0x1078   : > { %s2105_s1 = sshll.u32 %s3171_s4, 4  ;;  %s2788_s2 = smov [#allocation6]   ;;  %s3302_s1 = int_to_ptr.vmem [resolvable:$true] %s2105_s1 }
0x1079   : > { %s2680_s3 = scalar_lea.vmem %s3302_s1, 512  ;;  %s2684_s6 = sshll.u32 %s2788_s2, 4  ;;  %s2685_s6 = int_to_ptr.vmem [resolvable:$false] %s2684_s6 }
0x107a   : > { %p2681_p1 = scmp.ne.s32.totalorder %s3302_s1, %s2680_s3  ;;  %s2686_s5 = scalar_lea.vmem %s2685_s6, 1024 }
0x107b   : > { %p2687_p4 = scmp.lt.s32.totalorder %s3302_s1, %s2685_s6  ;;  %p2688_p7 = scmp.lt.s32.totalorder %s2686_s5, %s2680_s3 }
0x107c   : > { %p2682_p2 = pnand %p2681_p1, %p2910_p5 }
0x107d   : > { %p2689_p8 = por %p2688_p7, %p2687_p4 }
0x107e   : > { %p2683_p3 = pneg %p2682_p2 }
0x1080   : > { %p2690_p9 = pnand %p2689_p8, %p2683_p3 }
0x1082   : > { %2693 = shalt.err (!%p2690_p9)
}
0x1083   : > { %s2694_s4 = scalar_lea.hbm %s3299_s23, 512  ;;  %s2698_s26 = scalar_lea.hbm %s3400_s15, 1024 }
0x1084   : > { %p2695_p10 = scmp.ne.s32.totalorder %s3299_s23, %s2694_s4  ;;  %p2699_p13 = scmp.lt.u32.totalorder %s3299_s23, %s3400_s15 }
0x1085   : > { %p2700_p0 = scmp.lt.u32.totalorder %s2698_s26, %s2694_s4  ;;  %p2702_p2 = scmp.lt.u32.totalorder %s2694_s4, %s3299_s23 }
0x1086   : > { %p2696_p11 = pnand %p2695_p10, %p2910_p5 }
0x1087   : > { %p2701_p1 = por %p2700_p0, %p2699_p13 }
0x1088   : > { %p2697_p12 = pneg %p2696_p11 }
0x1089   : > { %p2703_p3 = por %p2702_p2, %p2701_p1 }
0x108b   : > { %p2704_p4 = pnand %p2703_p3, %p2697_p12 }
0x108d   : > { %2707 = shalt.err (!%p2704_p4)
}
0x108e   : > { %2540 = dma.vmem_to_hbm [thread:$0]  (%p2910_p5), %s3302_s1, 512, %s3299_s23, %s3267_s25, %s2787_s7, %s2787_s7, %s3439_s17   ;;  %v2043_v26 = vsub.s32 4, %v3089_v13  ;;  %v2048_v27 = vsub.s32 5, %v3089_v13 }
0x108f   : > { %s2268_s3 = sshll.u32 %s3013_s16, 3  ;;  %s2318_s6 = sshll.u32 %s2891_s22, 7 }
0x1090   : > { %v2044_v28 = vrot.slane %v3095_v24, %v2043_v26  ;;  %v2049_v32 = vrot.slane %v3095_v24, %v2048_v27  ;;  %s528_s17 = scalar_lea.vmem [#allocation2], %s2268_s3  ;;  %s3339_s1 = scalar_lea.hbm %s3398_s13, %s2318_s6 }
0x1091   : > { %s2076_s25 = sshll.u32 %s528_s17, 4  ;;  %s2053_s5 = scalar_lea.sflag [#allocation3], %s3013_s16  ;;  %s3341_s25 = int_to_ptr.vmem [resolvable:$true] %s2076_s25 }
0x1092   : > { %s2708_s4 = scalar_lea.vmem %s3341_s25, 128  ;;  %s2789_s22 = smov [#allocation2]  }
0x1093   : > { %p2709_p7 = scmp.ne.s32.totalorder %s3341_s25, %s2708_s4  ;;  %s2712_s30 = sshll.u32 %s2789_s22, 4  ;;  %s2713_s30 = int_to_ptr.vmem [resolvable:$false] %s2712_s30 }
0x1094   : > { %s2714_s27 = scalar_lea.vmem %s2713_s30, 256  ;;  %p2715_p10 = scmp.lt.s32.totalorder %s3341_s25, %s2713_s30 }
0x1095   : > { %p2710_p8 = pnand %p2709_p7, %p2910_p5  ;;  %p2716_p11 = scmp.lt.s32.totalorder %s2714_s27, %s2708_s4 }
0x1097   : > { %p2711_p9 = pneg %p2710_p8  ;;  %p2717_p12 = por %p2716_p11, %p2715_p10 }
0x1099   : > { %p2718_p13 = pnand %p2717_p12, %p2711_p9 }
0x10f6   : > { %v2036_v12 = vpop.xlane.xlu0 %2035 }
0x10f7   : > { %v2037_v23 = vmul.f32 0.03125, %v2036_v12 }
0x10f9   : > { %v2038_v25 = vadd.f32 1e-06, %v2037_v23 }
0x10fb   : > { %2650 = vrsqrt.f32 %v2038_v25 }
0x1105   : > { %v2651_v29 = vpop.eup %2650 }
0x1106   : > { %v2040_v30 = vmul.f32 %v2651_v29, %v3250_v21 }
0x1108   : > { %v2045_v33 = vmul.f32 %v2044_v28, %v2040_v30 }
0x110a   : > { %v2050_v34 = vadd.f32 %v2049_v32, %v2045_v33 }
0x110c   : > { %2051 = vst.msk [vmem:[%s528_s17] sm:$0xff] %vm580_vm1, %v2050_v34 }
0x110d   : > { %2721 = shalt.err (!%p2718_p13)
}
0x110e   : > { %s2722_s16 = scalar_lea.hbm %s3339_s1, 128  ;;  %s2726_s2 = scalar_lea.hbm %s3398_s13, 256 }
0x110f   : > { %p2723_p0 = scmp.ne.s32.totalorder %s3339_s1, %s2722_s16  ;;  %p2727_p3 = scmp.lt.u32.totalorder %s3339_s1, %s3398_s13 }
0x1110   : > { %p2728_p4 = scmp.lt.u32.totalorder %s2726_s2, %s2722_s16  ;;  %p2730_p8 = scmp.lt.u32.totalorder %s2722_s16, %s3339_s1 }
0x1111   : > { %p2724_p1 = pnand %p2723_p0, %p2910_p5 }
0x1112   : > { %p2729_p7 = por %p2728_p4, %p2727_p3 }
0x1113   : > { %p2725_p2 = pneg %p2724_p1 }
0x1114   : > { %p2731_p9 = por %p2730_p8, %p2729_p7 }
0x1116   : > { %p2732_p10 = pnand %p2731_p9, %p2725_p2 }
0x1118   : > { %2735 = shalt.err (!%p2732_p10)
}
0x1119   : > { %2538 = dma.vmem_to_hbm [thread:$0]  (%p2910_p5), %s3341_s25, 128, %s3339_s1, %s2053_s5  }
0x111a PF: > { %p2554_p11 = scmp.ge.s32.totalorder %s2774_s21, 2  ;;  %s2120_s17 = sand.u32 1, %s2762_s18  }
0x111b   : > { %s2121_s7 = scalar_lea.sflag [#allocation3], %s2120_s17 }
0x111c   : > { %p2545_p12 = pnand %p2554_p11, %p2914_p6 }
0x111e   : > { %2753 = dma.done.wait (!%p2545_p12), %s2121_s7, 128  }
0x111f   : > { %2755 = vsyncadd (!%p2545_p12), %s2121_s7, 4294967168  ;;  %s3442_s23 = sadd.s32 4294967294, %s2774_s21  }
0x1120   : > { %s2129_s4 = sand.u32 1, %s3442_s23  }
0x1121   : > { %s2130_s22 = scalar_lea.sflag [#allocation5], %s2129_s4 }
0x1122   : > { %2757 = dma.done.wait (!%p2545_p12), %s2130_s22, 1024  }
0x1123   : > { %2759 = vsyncadd (!%p2545_p12), %s2130_s22, 4294966272  ;;  %s3443_s28 = sld [smem:[#allocation9_spill]]  ;;  %p29_p5 = scmp.ge.s32.totalorder %s2895_s24, 4  }
0x1124   : > { %s3444_s18 = smov %s2766_s19  ;;  %s3445_s19 = smov %s2770_s20 }
0x1125   : > { %s3447_s21 = smov %s2895_s24  ;;  %31 = sbr.rel (!%p29_p5) target bundleno = 14 (0xe), region = 148 }
0x1129   : > { %s3446_s20 = smov %s3443_s28 }
0x112c   :  { %2144 = vsyncpa [#allocation3], 1 }
0x112d   :  { %2146 = vsyncpa [#allocation3 + $0x1], 1 }
0x112e   :  { %2147 = vsyncpa [#allocation5], 1 }
0x112f   :  { %2149 = vsyncpa [#allocation5 + $0x1], 1 }

</bundles_post_ra>
